<compile_context>
chip_gen: v5e
topology: v5e:2x2
jax: 0.10.0
libtpu: 0.0.40
codegen_flags: <defaults>
</compile_context>

<pallas_src>
import functools

import jax
import jax.numpy as jnp
from jax.experimental import pallas as pl
from jax.experimental.pallas import tpu as pltpu


def _choose_b_tile(batch):
    """Batch tile: multiple of 16 (bf16 sublane pack), <=128, and when the batch allows
    it keep >= 2 grid steps so the 'parallel' axis lands work on both v7x TensorCores."""
    b16 = ((batch + 15) // 16) * 16
    if b16 <= 16:
        return 16
    half = ((b16 // 2 + 15) // 16) * 16
    return max(16, min(128, half))


def lstm_fused_kernel(x_ref, w_ih_t_ref, w_hh_t_ref, bias_ref, w_fc_ref, b_fc_ref,
                      out_ref, pg_ref, *, seq_len, hidden_dim, embed_dim):
    """Input projection + full LSTM time recurrence + fused fc/sigmoid head for one batch tile.

    x_ref      : (B_TILE, T*E)  bf16  embedded tokens (lane-dense stream, only per-tile DMA)
    w_ih_t_ref : (E, 4H)        bf16  pre-transposed input weights (resident)
    w_hh_t_ref : (H, 4H)        bf16  pre-transposed recurrent weights (resident)
    bias_ref   : (1, 4H)        f32   b_ih + b_hh
    w_fc_ref   : (1, H)         f32
    b_fc_ref   : (1, 1)         f32   (SMEM scalar)
    out_ref    : (B_TILE, 1)    f32   one masked vst per grid step (negligible)
    pg_ref     : (B_TILE, T*4H) f32   VMEM scratch: pre-gates for all timesteps
    """
    H = hidden_dim
    E = embed_dim
    G = 4 * H
    bt = x_ref.shape[0]

    # ---- prologue: input projection for ALL timesteps (off the serial path) ----------
    w_ih_t = w_ih_t_ref[...]                                    # loaded once
    bias_b = jnp.broadcast_to(bias_ref[...], (bt, G))           # hoisted broadcast
    for t in range(seq_len):
        x_t = x_ref[:, t * E:(t + 1) * E]                       # static lane slice, bf16
        pg_ref[:, t * G:(t + 1) * G] = (
            jnp.dot(x_t, w_ih_t, preferred_element_type=jnp.float32) + bias_b)

    # ---- serial recurrence: only h @ W_hh^T + gate math on the critical path ---------
    w_hh_t = w_hh_t_ref[...]                                    # resident, loaded once
    h = jnp.zeros((bt, H), jnp.float32)
    c = jnp.zeros((bt, H), jnp.float32)

    def lstm_step(gates, h, c):
        # i/f sigmoids on one contiguous (bt, 2H) slab; EUP-approx reciprocal keeps the
        # divide off the VALU and shortens the per-step critical path.
        if_sig = pl.reciprocal(1.0 + jnp.exp(-gates[:, 0:2 * H]), approx=True)
        i_g = if_sig[:, 0:H]
        f_g = if_sig[:, H:2 * H]
        g_g = jnp.tanh(gates[:, 2 * H:3 * H])
        o_g = pl.reciprocal(1.0 + jnp.exp(-gates[:, 3 * H:4 * H]), approx=True)
        c_new = f_g * c + i_g * g_g
        h_new = o_g * jnp.tanh(c_new)
        return h_new, c_new

    if seq_len <= 16:
        # Small static T: full unroll (LLO scheduler visibility, no loop overhead).
        for t in range(seq_len):
            gates = pg_ref[:, t * G:(t + 1) * G] + jnp.dot(
                h.astype(jnp.bfloat16), w_hh_t, preferred_element_type=jnp.float32)
            h, c = lstm_step(gates, h, c)
    else:
        # Larger T: modest-unroll fori_loop keeps instruction memory / vreg pressure bounded.
        def body(t, carry):
            h, c = carry
            off = pl.multiple_of(t * G, G)
            gates = pg_ref[:, pl.ds(off, G)] + jnp.dot(
                h.astype(jnp.bfloat16), w_hh_t, preferred_element_type=jnp.float32)
            return lstm_step(gates, h, c)
        h, c = jax.lax.fori_loop(0, seq_len, body, (h, c), unroll=4)

    # ---- fc(H,1) + sigmoid head: VPU mul + lane reduction (no N=1 MXU matmul) ---------
    logits = jnp.sum(h * w_fc_ref[...], axis=-1, keepdims=True) + b_fc_ref[0, 0]
    out_ref[...] = pl.reciprocal(1.0 + jnp.exp(-logits), approx=True).astype(out_ref.dtype)


def lstm_classifier_forward(tokens, params):
    B, T = tokens.shape
    E = params["embedding"].shape[1]
    H = params["w_hh"].shape[1]
    G = 4 * H

    # ---- plain-JAX glue ---------------------------------------------------------------
    # TODO(synk): the embedding gather stays in XLA; Pallas streams the bf16 embedded
    # tokens and does input projection + recurrence + head on-chip.
    emb = params["embedding"][tokens]                            # (B, T, E) f32
    x = emb.reshape(B, T * E).astype(jnp.bfloat16)               # lane-dense bf16 stream

    b_tile = _choose_b_tile(B)
    B_pad = ((B + b_tile - 1) // b_tile) * b_tile
    if B_pad != B:
        x = jnp.pad(x, ((0, B_pad - B), (0, 0)))

    w_ih_t = params["w_ih"].T.astype(jnp.bfloat16)               # (E, 4H), transposed once
    w_hh_t = params["w_hh"].T.astype(jnp.bfloat16)               # (H, 4H), transposed once
    bias = (params["b_ih"] + params["b_hh"]).reshape(1, G).astype(jnp.float32)
    w_fc = params["w_fc"].astype(jnp.float32)                    # (1, H)
    b_fc = params["b_fc"].reshape(1, 1).astype(jnp.float32)      # (1, 1) -> SMEM

    kernel = functools.partial(lstm_fused_kernel, seq_len=T, hidden_dim=H, embed_dim=E)

    out = pl.pallas_call(
        kernel,
        out_shape=jax.ShapeDtypeStruct((B_pad, 1), jnp.float32),
        grid_spec=pltpu.PrefetchScalarGridSpec(
            num_scalar_prefetch=0,
            grid=(B_pad // b_tile,),                             # batch-parallel axis
            in_specs=[
                pl.BlockSpec((b_tile, T * E), lambda i: (i, 0)),   # embedded tokens (bf16)
                pl.BlockSpec((E, G), lambda i: (0, 0)),            # W_ih^T (resident)
                pl.BlockSpec((H, G), lambda i: (0, 0)),            # W_hh^T (resident)
                pl.BlockSpec((1, G), lambda i: (0, 0)),            # b_ih + b_hh
                pl.BlockSpec((1, H), lambda i: (0, 0)),            # W_fc
                pl.BlockSpec(memory_space=pltpu.MemorySpace.SMEM), # b_fc scalar
            ],
            out_specs=pl.BlockSpec((b_tile, 1), lambda i: (i, 0)),
            scratch_shapes=[pltpu.VMEM((b_tile, T * G), jnp.float32)],  # all-step pre-gates
        ),
        compiler_params=pltpu.CompilerParams(
            dimension_semantics=("parallel",)),                  # shards batch across TCs
    )(x, w_ih_t, w_hh_t, bias, w_fc, b_fc)

    return jnp.squeeze(out[:B])   # torch .squeeze(): (B, 1) -> (B,)


def reference_forward(tokens, params):
    """Pure-JAX f32 reference matching PyTorch LSTMClassifier semantics."""
    emb = params["embedding"][tokens]                # (B, T, E)
    B, T, _ = emb.shape
    H = params["w_hh"].shape[1]
    h = jnp.zeros((B, H), jnp.float32)
    c = jnp.zeros((B, H), jnp.float32)
    for t in range(T):
        x_t = emb[:, t, :]
        g = (x_t @ params["w_ih"].T + h @ params["w_hh"].T
             + params["b_ih"] + params["b_hh"])
        i = jax.nn.sigmoid(g[:, :H])
        f = jax.nn.sigmoid(g[:, H:2 * H])
        gg = jnp.tanh(g[:, 2 * H:3 * H])
        o = jax.nn.sigmoid(g[:, 3 * H:])
        c = f * c + i * gg
        h = o * jnp.tanh(c)
    logits = h @ params["w_fc"].T + params["b_fc"]
    return jnp.squeeze(jax.nn.sigmoid(logits))


def make_params(key, vocab_size, embed_dim, hidden_dim):
    ks = jax.random.split(key, 8)
    embedding = 0.1 * jax.random.normal(ks[0], (vocab_size, embed_dim), jnp.float32)
    embedding = embedding.at[0].set(0.0)   # padding_idx=0 row is zeros
    return {
        "embedding": embedding,
        "w_ih": 0.1 * jax.random.normal(ks[1], (4 * hidden_dim, embed_dim), jnp.float32),
        "w_hh": 0.1 * jax.random.normal(ks[2], (4 * hidden_dim, hidden_dim), jnp.float32),
        "b_ih": 0.1 * jax.random.normal(ks[3], (4 * hidden_dim,), jnp.float32),
        "b_hh": 0.1 * jax.random.normal(ks[4], (4 * hidden_dim,), jnp.float32),
        "w_fc": 0.1 * jax.random.normal(ks[5], (1, hidden_dim), jnp.float32),
        "b_fc": 0.1 * jax.random.normal(ks[6], (1,), jnp.float32),
    }


if __name__ == "__main__":
    VOCAB, EMBED, HIDDEN = 50, 32, 128
    B, T = 2, 8

    key = jax.random.PRNGKey(0)
    k_params, k_tok = jax.random.split(key)
    params = make_params(k_params, VOCAB, EMBED, HIDDEN)
    tokens = jax.random.randint(k_tok, (B, T), 0, VOCAB, dtype=jnp.int32)

    out = jax.block_until_ready(lstm_classifier_forward(tokens, params))
    ref = jax.block_until_ready(reference_forward(tokens, params))

    assert out.shape == (B,), f"bad output shape {out.shape}"
    # bf16 MXU operands / bf16 embedding stream (f32 accumulation, f32 gate math) +
    # EUP-approx sigmoid -> mixed-precision tolerance.
    assert jnp.allclose(out, ref, atol=1e-2, rtol=1e-2), (out, ref)
    print("KERNEL_OK")
</pallas_src>

<mosaic_0001>
module attributes {stable_mosaic.version = 11 : i64} {
  func.func @lstm_fused_kernel(%arg0: i32, %arg1: memref<16x256xbf16, #tpu.memory_space<vmem>>, %arg2: memref<32x512xbf16, #tpu.memory_space<vmem>>, %arg3: memref<128x512xbf16, #tpu.memory_space<vmem>>, %arg4: memref<1x512xf32, #tpu.memory_space<vmem>>, %arg5: memref<1x128xf32, #tpu.memory_space<vmem>>, %arg6: memref<1x1xf32, #tpu.memory_space<smem>>, %arg7: memref<16x1xf32, #tpu.memory_space<vmem>>, %arg8: memref<16x4096xf32, #tpu.memory_space<vmem>>) attributes {dimension_semantics = [#tpu.dimension_semantics<parallel>], iteration_bounds = array<i64: 1>, scalar_prefetch = 0 : i64, scratch_operands = 1 : i64, tpu.core_type = #tpu.core_type<tc>, window_params = [{transform_indices = @transform_0, window_bounds = array<i64: 16, 256>}, {pipeline_mode = #tpu.pipeline_mode<synchronous>, transform_indices = @transform_1, window_bounds = array<i64: 32, 512>}, {pipeline_mode = #tpu.pipeline_mode<synchronous>, transform_indices = @transform_2, window_bounds = array<i64: 128, 512>}, {pipeline_mode = #tpu.pipeline_mode<synchronous>, transform_indices = @transform_3, window_bounds = array<i64: 1, 512>}, {pipeline_mode = #tpu.pipeline_mode<synchronous>, transform_indices = @transform_4, window_bounds = array<i64: 1, 128>}, {transform_indices = @transform_5, window_bounds = array<i64: 1, 1>}, {transform_indices = @transform_6, window_bounds = array<i64: 16, 1>}]} {
    %c0 = arith.constant 0 : index
    %c0_0 = arith.constant 0 : index
    %0 = vector.load %arg2[%c0, %c0_0] : memref<32x512xbf16, #tpu.memory_space<vmem>>, vector<32x512xbf16>
    %c0_1 = arith.constant 0 : index
    %c0_2 = arith.constant 0 : index
    %1 = vector.load %arg4[%c0_1, %c0_2] : memref<1x512xf32, #tpu.memory_space<vmem>>, vector<1x512xf32>
    %2 = vector.shape_cast %1 : vector<1x512xf32> to vector<1x512xf32>
    %3 = vector.broadcast %2 : vector<1x512xf32> to vector<16x512xf32>
    %c0_3 = arith.constant 0 : index
    %c0_4 = arith.constant 0 : index
    %4 = vector.load %arg1[%c0_3, %c0_4] : memref<16x256xbf16, #tpu.memory_space<vmem>>, vector<16x32xbf16>
    %cst = arith.constant dense<0.000000e+00> : vector<16x512xf32>
    %5 = tpu.matmul %4, %0, %cst {dimension_numbers = #tpu.dot_dimension_numbers<[1], [0], [0], [1], [0, 0, 1, 1], [], []>} : vector<16x32xbf16>, vector<32x512xbf16>, vector<16x512xf32> -> vector<16x512xf32>
    %6 = arith.addf %5, %3 : vector<16x512xf32>
    %c0_5 = arith.constant 0 : index
    %c0_6 = arith.constant 0 : index
    %7 = vector.load %arg8[%c0_5, %c0_6] : memref<16x4096xf32, #tpu.memory_space<vmem>>, vector<16x512xf32>
    tpu.vector_store %arg8[%c0_5, %c0_6], %6 {strides = array<i32>} : memref<16x4096xf32, #tpu.memory_space<vmem>>, vector<16x512xf32>,
    %c0_7 = arith.constant 0 : index
    %c32 = arith.constant 32 : index
    %8 = vector.load %arg1[%c0_7, %c32] : memref<16x256xbf16, #tpu.memory_space<vmem>>, vector<16x32xbf16>
    %cst_8 = arith.constant dense<0.000000e+00> : vector<16x512xf32>
    %9 = tpu.matmul %8, %0, %cst_8 {dimension_numbers = #tpu.dot_dimension_numbers<[1], [0], [0], [1], [0, 0, 1, 1], [], []>} : vector<16x32xbf16>, vector<32x512xbf16>, vector<16x512xf32> -> vector<16x512xf32>
    %10 = arith.addf %9, %3 : vector<16x512xf32>
    %c0_9 = arith.constant 0 : index
    %c512 = arith.constant 512 : index
    %11 = vector.load %arg8[%c0_9, %c512] : memref<16x4096xf32, #tpu.memory_space<vmem>>, vector<16x512xf32>
    tpu.vector_store %arg8[%c0_9, %c512], %10 {strides = array<i32>} : memref<16x4096xf32, #tpu.memory_space<vmem>>, vector<16x512xf32>,
    %c0_10 = arith.constant 0 : index
    %c64 = arith.constant 64 : index
    %12 = vector.load %arg1[%c0_10, %c64] : memref<16x256xbf16, #tpu.memory_space<vmem>>, vector<16x32xbf16>
    %cst_11 = arith.constant dense<0.000000e+00> : vector<16x512xf32>
    %13 = tpu.matmul %12, %0, %cst_11 {dimension_numbers = #tpu.dot_dimension_numbers<[1], [0], [0], [1], [0, 0, 1, 1], [], []>} : vector<16x32xbf16>, vector<32x512xbf16>, vector<16x512xf32> -> vector<16x512xf32>
    %14 = arith.addf %13, %3 : vector<16x512xf32>
    %c0_12 = arith.constant 0 : index
    %c1024 = arith.constant 1024 : index
    %15 = vector.load %arg8[%c0_12, %c1024] : memref<16x4096xf32, #tpu.memory_space<vmem>>, vector<16x512xf32>
    tpu.vector_store %arg8[%c0_12, %c1024], %14 {strides = array<i32>} : memref<16x4096xf32, #tpu.memory_space<vmem>>, vector<16x512xf32>,
    %c0_13 = arith.constant 0 : index
    %c96 = arith.constant 96 : index
    %16 = vector.load %arg1[%c0_13, %c96] : memref<16x256xbf16, #tpu.memory_space<vmem>>, vector<16x32xbf16>
    %cst_14 = arith.constant dense<0.000000e+00> : vector<16x512xf32>
    %17 = tpu.matmul %16, %0, %cst_14 {dimension_numbers = #tpu.dot_dimension_numbers<[1], [0], [0], [1], [0, 0, 1, 1], [], []>} : vector<16x32xbf16>, vector<32x512xbf16>, vector<16x512xf32> -> vector<16x512xf32>
    %18 = arith.addf %17, %3 : vector<16x512xf32>
    %c0_15 = arith.constant 0 : index
    %c1536 = arith.constant 1536 : index
    %19 = vector.load %arg8[%c0_15, %c1536] : memref<16x4096xf32, #tpu.memory_space<vmem>>, vector<16x512xf32>
    tpu.vector_store %arg8[%c0_15, %c1536], %18 {strides = array<i32>} : memref<16x4096xf32, #tpu.memory_space<vmem>>, vector<16x512xf32>,
    %c0_16 = arith.constant 0 : index
    %c128 = arith.constant 128 : index
    %20 = vector.load %arg1[%c0_16, %c128] : memref<16x256xbf16, #tpu.memory_space<vmem>>, vector<16x32xbf16>
    %cst_17 = arith.constant dense<0.000000e+00> : vector<16x512xf32>
    %21 = tpu.matmul %20, %0, %cst_17 {dimension_numbers = #tpu.dot_dimension_numbers<[1], [0], [0], [1], [0, 0, 1, 1], [], []>} : vector<16x32xbf16>, vector<32x512xbf16>, vector<16x512xf32> -> vector<16x512xf32>
    %22 = arith.addf %21, %3 : vector<16x512xf32>
    %c0_18 = arith.constant 0 : index
    %c2048 = arith.constant 2048 : index
    %23 = vector.load %arg8[%c0_18, %c2048] : memref<16x4096xf32, #tpu.memory_space<vmem>>, vector<16x512xf32>
    tpu.vector_store %arg8[%c0_18, %c2048], %22 {strides = array<i32>} : memref<16x4096xf32, #tpu.memory_space<vmem>>, vector<16x512xf32>,
    %c0_19 = arith.constant 0 : index
    %c160 = arith.constant 160 : index
    %24 = vector.load %arg1[%c0_19, %c160] : memref<16x256xbf16, #tpu.memory_space<vmem>>, vector<16x32xbf16>
    %cst_20 = arith.constant dense<0.000000e+00> : vector<16x512xf32>
    %25 = tpu.matmul %24, %0, %cst_20 {dimension_numbers = #tpu.dot_dimension_numbers<[1], [0], [0], [1], [0, 0, 1, 1], [], []>} : vector<16x32xbf16>, vector<32x512xbf16>, vector<16x512xf32> -> vector<16x512xf32>
    %26 = arith.addf %25, %3 : vector<16x512xf32>
    %c0_21 = arith.constant 0 : index
    %c2560 = arith.constant 2560 : index
    %27 = vector.load %arg8[%c0_21, %c2560] : memref<16x4096xf32, #tpu.memory_space<vmem>>, vector<16x512xf32>
    tpu.vector_store %arg8[%c0_21, %c2560], %26 {strides = array<i32>} : memref<16x4096xf32, #tpu.memory_space<vmem>>, vector<16x512xf32>,
    %c0_22 = arith.constant 0 : index
    %c192 = arith.constant 192 : index
    %28 = vector.load %arg1[%c0_22, %c192] : memref<16x256xbf16, #tpu.memory_space<vmem>>, vector<16x32xbf16>
    %cst_23 = arith.constant dense<0.000000e+00> : vector<16x512xf32>
    %29 = tpu.matmul %28, %0, %cst_23 {dimension_numbers = #tpu.dot_dimension_numbers<[1], [0], [0], [1], [0, 0, 1, 1], [], []>} : vector<16x32xbf16>, vector<32x512xbf16>, vector<16x512xf32> -> vector<16x512xf32>
    %30 = arith.addf %29, %3 : vector<16x512xf32>
    %c0_24 = arith.constant 0 : index
    %c3072 = arith.constant 3072 : index
    %31 = vector.load %arg8[%c0_24, %c3072] : memref<16x4096xf32, #tpu.memory_space<vmem>>, vector<16x512xf32>
    tpu.vector_store %arg8[%c0_24, %c3072], %30 {strides = array<i32>} : memref<16x4096xf32, #tpu.memory_space<vmem>>, vector<16x512xf32>,
    %c0_25 = arith.constant 0 : index
    %c224 = arith.constant 224 : index
    %32 = vector.load %arg1[%c0_25, %c224] : memref<16x256xbf16, #tpu.memory_space<vmem>>, vector<16x32xbf16>
    %cst_26 = arith.constant dense<0.000000e+00> : vector<16x512xf32>
    %33 = tpu.matmul %32, %0, %cst_26 {dimension_numbers = #tpu.dot_dimension_numbers<[1], [0], [0], [1], [0, 0, 1, 1], [], []>} : vector<16x32xbf16>, vector<32x512xbf16>, vector<16x512xf32> -> vector<16x512xf32>
    %34 = arith.addf %33, %3 : vector<16x512xf32>
    %c0_27 = arith.constant 0 : index
    %c3584 = arith.constant 3584 : index
    %35 = vector.load %arg8[%c0_27, %c3584] : memref<16x4096xf32, #tpu.memory_space<vmem>>, vector<16x512xf32>
    tpu.vector_store %arg8[%c0_27, %c3584], %34 {strides = array<i32>} : memref<16x4096xf32, #tpu.memory_space<vmem>>, vector<16x512xf32>,
    %c0_28 = arith.constant 0 : index
    %c0_29 = arith.constant 0 : index
    %36 = vector.load %arg3[%c0_28, %c0_29] : memref<128x512xbf16, #tpu.memory_space<vmem>>, vector<128x512xbf16>
    %cst_30 = arith.constant 0.000000e+00 : f32
    %37 = vector.broadcast %cst_30 : f32 to vector<16x128xf32>
    %cst_31 = arith.constant 0.000000e+00 : f32
    %38 = vector.broadcast %cst_31 : f32 to vector<16x128xf32>
    %c0_32 = arith.constant 0 : index
    %c0_33 = arith.constant 0 : index
    %39 = vector.load %arg8[%c0_32, %c0_33] : memref<16x4096xf32, #tpu.memory_space<vmem>>, vector<16x512xf32>
    %40 = arith.truncf %37 : vector<16x128xf32> to vector<16x128xbf16>
    %cst_34 = arith.constant dense<0.000000e+00> : vector<16x512xf32>
    %41 = tpu.matmul %40, %36, %cst_34 {dimension_numbers = #tpu.dot_dimension_numbers<[1], [0], [0], [1], [0, 0, 1, 1], [], []>} : vector<16x128xbf16>, vector<128x512xbf16>, vector<16x512xf32> -> vector<16x512xf32>
    %42 = arith.addf %39, %41 : vector<16x512xf32>
    %43 = vector.extract_strided_slice %42 {offsets = [0, 0], sizes = [16, 256], strides = [1, 1]} : vector<16x512xf32> to vector<16x256xf32>
    %cst_35 = arith.constant 0.000000e+00 : f32
    %44 = vector.broadcast %cst_35 : f32 to vector<16x256xf32>
    %45 = arith.subf %44, %43 : vector<16x256xf32>
    %46 = math.exp %45 : vector<16x256xf32>
    %cst_36 = arith.constant 1.000000e+00 : f32
    %47 = vector.broadcast %cst_36 : f32 to vector<16x256xf32>
    %48 = arith.addf %47, %46 : vector<16x256xf32>
    %49 = tpu.reciprocal %48 {approx = true} : vector<16x256xf32> -> vector<16x256xf32>
    %50 = vector.extract_strided_slice %49 {offsets = [0, 0], sizes = [16, 128], strides = [1, 1]} : vector<16x256xf32> to vector<16x128xf32>
    %51 = vector.extract_strided_slice %49 {offsets = [0, 128], sizes = [16, 128], strides = [1, 1]} : vector<16x256xf32> to vector<16x128xf32>
    %52 = vector.extract_strided_slice %42 {offsets = [0, 256], sizes = [16, 128], strides = [1, 1]} : vector<16x512xf32> to vector<16x128xf32>
    %53 = math.tanh %52 : vector<16x128xf32>
    %54 = vector.extract_strided_slice %42 {offsets = [0, 384], sizes = [16, 128], strides = [1, 1]} : vector<16x512xf32> to vector<16x128xf32>
    %cst_37 = arith.constant 0.000000e+00 : f32
    %55 = vector.broadcast %cst_37 : f32 to vector<16x128xf32>
    %56 = arith.subf %55, %54 : vector<16x128xf32>
    %57 = math.exp %56 : vector<16x128xf32>
    %cst_38 = arith.constant 1.000000e+00 : f32
    %58 = vector.broadcast %cst_38 : f32 to vector<16x128xf32>
    %59 = arith.addf %58, %57 : vector<16x128xf32>
    %60 = tpu.reciprocal %59 {approx = true} : vector<16x128xf32> -> vector<16x128xf32>
    %61 = arith.mulf %51, %38 : vector<16x128xf32>
    %62 = arith.mulf %50, %53 : vector<16x128xf32>
    %63 = arith.addf %61, %62 : vector<16x128xf32>
    %64 = math.tanh %63 : vector<16x128xf32>
    %65 = arith.mulf %60, %64 : vector<16x128xf32>
    %c0_39 = arith.constant 0 : index
    %c512_40 = arith.constant 512 : index
    %66 = vector.load %arg8[%c0_39, %c512_40] : memref<16x4096xf32, #tpu.memory_space<vmem>>, vector<16x512xf32>
    %67 = arith.truncf %65 : vector<16x128xf32> to vector<16x128xbf16>
    %cst_41 = arith.constant dense<0.000000e+00> : vector<16x512xf32>
    %68 = tpu.matmul %67, %36, %cst_41 {dimension_numbers = #tpu.dot_dimension_numbers<[1], [0], [0], [1], [0, 0, 1, 1], [], []>} : vector<16x128xbf16>, vector<128x512xbf16>, vector<16x512xf32> -> vector<16x512xf32>
    %69 = arith.addf %66, %68 : vector<16x512xf32>
    %70 = vector.extract_strided_slice %69 {offsets = [0, 0], sizes = [16, 256], strides = [1, 1]} : vector<16x512xf32> to vector<16x256xf32>
    %cst_42 = arith.constant 0.000000e+00 : f32
    %71 = vector.broadcast %cst_42 : f32 to vector<16x256xf32>
    %72 = arith.subf %71, %70 : vector<16x256xf32>
    %73 = math.exp %72 : vector<16x256xf32>
    %cst_43 = arith.constant 1.000000e+00 : f32
    %74 = vector.broadcast %cst_43 : f32 to vector<16x256xf32>
    %75 = arith.addf %74, %73 : vector<16x256xf32>
    %76 = tpu.reciprocal %75 {approx = true} : vector<16x256xf32> -> vector<16x256xf32>
    %77 = vector.extract_strided_slice %76 {offsets = [0, 0], sizes = [16, 128], strides = [1, 1]} : vector<16x256xf32> to vector<16x128xf32>
    %78 = vector.extract_strided_slice %76 {offsets = [0, 128], sizes = [16, 128], strides = [1, 1]} : vector<16x256xf32> to vector<16x128xf32>
    %79 = vector.extract_strided_slice %69 {offsets = [0, 256], sizes = [16, 128], strides = [1, 1]} : vector<16x512xf32> to vector<16x128xf32>
    %80 = math.tanh %79 : vector<16x128xf32>
    %81 = vector.extract_strided_slice %69 {offsets = [0, 384], sizes = [16, 128], strides = [1, 1]} : vector<16x512xf32> to vector<16x128xf32>
    %cst_44 = arith.constant 0.000000e+00 : f32
    %82 = vector.broadcast %cst_44 : f32 to vector<16x128xf32>
    %83 = arith.subf %82, %81 : vector<16x128xf32>
    %84 = math.exp %83 : vector<16x128xf32>
    %cst_45 = arith.constant 1.000000e+00 : f32
    %85 = vector.broadcast %cst_45 : f32 to vector<16x128xf32>
    %86 = arith.addf %85, %84 : vector<16x128xf32>
    %87 = tpu.reciprocal %86 {approx = true} : vector<16x128xf32> -> vector<16x128xf32>
    %88 = arith.mulf %78, %63 : vector<16x128xf32>
    %89 = arith.mulf %77, %80 : vector<16x128xf32>
    %90 = arith.addf %88, %89 : vector<16x128xf32>
    %91 = math.tanh %90 : vector<16x128xf32>
    %92 = arith.mulf %87, %91 : vector<16x128xf32>
    %c0_46 = arith.constant 0 : index
    %c1024_47 = arith.constant 1024 : index
    %93 = vector.load %arg8[%c0_46, %c1024_47] : memref<16x4096xf32, #tpu.memory_space<vmem>>, vector<16x512xf32>
    %94 = arith.truncf %92 : vector<16x128xf32> to vector<16x128xbf16>
    %cst_48 = arith.constant dense<0.000000e+00> : vector<16x512xf32>
    %95 = tpu.matmul %94, %36, %cst_48 {dimension_numbers = #tpu.dot_dimension_numbers<[1], [0], [0], [1], [0, 0, 1, 1], [], []>} : vector<16x128xbf16>, vector<128x512xbf16>, vector<16x512xf32> -> vector<16x512xf32>
    %96 = arith.addf %93, %95 : vector<16x512xf32>
    %97 = vector.extract_strided_slice %96 {offsets = [0, 0], sizes = [16, 256], strides = [1, 1]} : vector<16x512xf32> to vector<16x256xf32>
    %cst_49 = arith.constant 0.000000e+00 : f32
    %98 = vector.broadcast %cst_49 : f32 to vector<16x256xf32>
    %99 = arith.subf %98, %97 : vector<16x256xf32>
    %100 = math.exp %99 : vector<16x256xf32>
    %cst_50 = arith.constant 1.000000e+00 : f32
    %101 = vector.broadcast %cst_50 : f32 to vector<16x256xf32>
    %102 = arith.addf %101, %100 : vector<16x256xf32>
    %103 = tpu.reciprocal %102 {approx = true} : vector<16x256xf32> -> vector<16x256xf32>
    %104 = vector.extract_strided_slice %103 {offsets = [0, 0], sizes = [16, 128], strides = [1, 1]} : vector<16x256xf32> to vector<16x128xf32>
    %105 = vector.extract_strided_slice %103 {offsets = [0, 128], sizes = [16, 128], strides = [1, 1]} : vector<16x256xf32> to vector<16x128xf32>
    %106 = vector.extract_strided_slice %96 {offsets = [0, 256], sizes = [16, 128], strides = [1, 1]} : vector<16x512xf32> to vector<16x128xf32>
    %107 = math.tanh %106 : vector<16x128xf32>
    %108 = vector.extract_strided_slice %96 {offsets = [0, 384], sizes = [16, 128], strides = [1, 1]} : vector<16x512xf32> to vector<16x128xf32>
    %cst_51 = arith.constant 0.000000e+00 : f32
    %109 = vector.broadcast %cst_51 : f32 to vector<16x128xf32>
    %110 = arith.subf %109, %108 : vector<16x128xf32>
    %111 = math.exp %110 : vector<16x128xf32>
    %cst_52 = arith.constant 1.000000e+00 : f32
    %112 = vector.broadcast %cst_52 : f32 to vector<16x128xf32>
    %113 = arith.addf %112, %111 : vector<16x128xf32>
    %114 = tpu.reciprocal %113 {approx = true} : vector<16x128xf32> -> vector<16x128xf32>
    %115 = arith.mulf %105, %90 : vector<16x128xf32>
    %116 = arith.mulf %104, %107 : vector<16x128xf32>
    %117 = arith.addf %115, %116 : vector<16x128xf32>
    %118 = math.tanh %117 : vector<16x128xf32>
    %119 = arith.mulf %114, %118 : vector<16x128xf32>
    %c0_53 = arith.constant 0 : index
    %c1536_54 = arith.constant 1536 : index
    %120 = vector.load %arg8[%c0_53, %c1536_54] : memref<16x4096xf32, #tpu.memory_space<vmem>>, vector<16x512xf32>
    %121 = arith.truncf %119 : vector<16x128xf32> to vector<16x128xbf16>
    %cst_55 = arith.constant dense<0.000000e+00> : vector<16x512xf32>
    %122 = tpu.matmul %121, %36, %cst_55 {dimension_numbers = #tpu.dot_dimension_numbers<[1], [0], [0], [1], [0, 0, 1, 1], [], []>} : vector<16x128xbf16>, vector<128x512xbf16>, vector<16x512xf32> -> vector<16x512xf32>
    %123 = arith.addf %120, %122 : vector<16x512xf32>
    %124 = vector.extract_strided_slice %123 {offsets = [0, 0], sizes = [16, 256], strides = [1, 1]} : vector<16x512xf32> to vector<16x256xf32>
    %cst_56 = arith.constant 0.000000e+00 : f32
    %125 = vector.broadcast %cst_56 : f32 to vector<16x256xf32>
    %126 = arith.subf %125, %124 : vector<16x256xf32>
    %127 = math.exp %126 : vector<16x256xf32>
    %cst_57 = arith.constant 1.000000e+00 : f32
    %128 = vector.broadcast %cst_57 : f32 to vector<16x256xf32>
    %129 = arith.addf %128, %127 : vector<16x256xf32>
    %130 = tpu.reciprocal %129 {approx = true} : vector<16x256xf32> -> vector<16x256xf32>
    %131 = vector.extract_strided_slice %130 {offsets = [0, 0], sizes = [16, 128], strides = [1, 1]} : vector<16x256xf32> to vector<16x128xf32>
    %132 = vector.extract_strided_slice %130 {offsets = [0, 128], sizes = [16, 128], strides = [1, 1]} : vector<16x256xf32> to vector<16x128xf32>
    %133 = vector.extract_strided_slice %123 {offsets = [0, 256], sizes = [16, 128], strides = [1, 1]} : vector<16x512xf32> to vector<16x128xf32>
    %134 = math.tanh %133 : vector<16x128xf32>
    %135 = vector.extract_strided_slice %123 {offsets = [0, 384], sizes = [16, 128], strides = [1, 1]} : vector<16x512xf32> to vector<16x128xf32>
    %cst_58 = arith.constant 0.000000e+00 : f32
    %136 = vector.broadcast %cst_58 : f32 to vector<16x128xf32>
    %137 = arith.subf %136, %135 : vector<16x128xf32>
    %138 = math.exp %137 : vector<16x128xf32>
    %cst_59 = arith.constant 1.000000e+00 : f32
    %139 = vector.broadcast %cst_59 : f32 to vector<16x128xf32>
    %140 = arith.addf %139, %138 : vector<16x128xf32>
    %141 = tpu.reciprocal %140 {approx = true} : vector<16x128xf32> -> vector<16x128xf32>
    %142 = arith.mulf %132, %117 : vector<16x128xf32>
    %143 = arith.mulf %131, %134 : vector<16x128xf32>
    %144 = arith.addf %142, %143 : vector<16x128xf32>
    %145 = math.tanh %144 : vector<16x128xf32>
    %146 = arith.mulf %141, %145 : vector<16x128xf32>
    %c0_60 = arith.constant 0 : index
    %c2048_61 = arith.constant 2048 : index
    %147 = vector.load %arg8[%c0_60, %c2048_61] : memref<16x4096xf32, #tpu.memory_space<vmem>>, vector<16x512xf32>
    %148 = arith.truncf %146 : vector<16x128xf32> to vector<16x128xbf16>
    %cst_62 = arith.constant dense<0.000000e+00> : vector<16x512xf32>
    %149 = tpu.matmul %148, %36, %cst_62 {dimension_numbers = #tpu.dot_dimension_numbers<[1], [0], [0], [1], [0, 0, 1, 1], [], []>} : vector<16x128xbf16>, vector<128x512xbf16>, vector<16x512xf32> -> vector<16x512xf32>
    %150 = arith.addf %147, %149 : vector<16x512xf32>
    %151 = vector.extract_strided_slice %150 {offsets = [0, 0], sizes = [16, 256], strides = [1, 1]} : vector<16x512xf32> to vector<16x256xf32>
    %cst_63 = arith.constant 0.000000e+00 : f32
    %152 = vector.broadcast %cst_63 : f32 to vector<16x256xf32>
    %153 = arith.subf %152, %151 : vector<16x256xf32>
    %154 = math.exp %153 : vector<16x256xf32>
    %cst_64 = arith.constant 1.000000e+00 : f32
    %155 = vector.broadcast %cst_64 : f32 to vector<16x256xf32>
    %156 = arith.addf %155, %154 : vector<16x256xf32>
    %157 = tpu.reciprocal %156 {approx = true} : vector<16x256xf32> -> vector<16x256xf32>
    %158 = vector.extract_strided_slice %157 {offsets = [0, 0], sizes = [16, 128], strides = [1, 1]} : vector<16x256xf32> to vector<16x128xf32>
    %159 = vector.extract_strided_slice %157 {offsets = [0, 128], sizes = [16, 128], strides = [1, 1]} : vector<16x256xf32> to vector<16x128xf32>
    %160 = vector.extract_strided_slice %150 {offsets = [0, 256], sizes = [16, 128], strides = [1, 1]} : vector<16x512xf32> to vector<16x128xf32>
    %161 = math.tanh %160 : vector<16x128xf32>
    %162 = vector.extract_strided_slice %150 {offsets = [0, 384], sizes = [16, 128], strides = [1, 1]} : vector<16x512xf32> to vector<16x128xf32>
    %cst_65 = arith.constant 0.000000e+00 : f32
    %163 = vector.broadcast %cst_65 : f32 to vector<16x128xf32>
    %164 = arith.subf %163, %162 : vector<16x128xf32>
    %165 = math.exp %164 : vector<16x128xf32>
    %cst_66 = arith.constant 1.000000e+00 : f32
    %166 = vector.broadcast %cst_66 : f32 to vector<16x128xf32>
    %167 = arith.addf %166, %165 : vector<16x128xf32>
    %168 = tpu.reciprocal %167 {approx = true} : vector<16x128xf32> -> vector<16x128xf32>
    %169 = arith.mulf %159, %144 : vector<16x128xf32>
    %170 = arith.mulf %158, %161 : vector<16x128xf32>
    %171 = arith.addf %169, %170 : vector<16x128xf32>
    %172 = math.tanh %171 : vector<16x128xf32>
    %173 = arith.mulf %168, %172 : vector<16x128xf32>
    %c0_67 = arith.constant 0 : index
    %c2560_68 = arith.constant 2560 : index
    %174 = vector.load %arg8[%c0_67, %c2560_68] : memref<16x4096xf32, #tpu.memory_space<vmem>>, vector<16x512xf32>
    %175 = arith.truncf %173 : vector<16x128xf32> to vector<16x128xbf16>
    %cst_69 = arith.constant dense<0.000000e+00> : vector<16x512xf32>
    %176 = tpu.matmul %175, %36, %cst_69 {dimension_numbers = #tpu.dot_dimension_numbers<[1], [0], [0], [1], [0, 0, 1, 1], [], []>} : vector<16x128xbf16>, vector<128x512xbf16>, vector<16x512xf32> -> vector<16x512xf32>
    %177 = arith.addf %174, %176 : vector<16x512xf32>
    %178 = vector.extract_strided_slice %177 {offsets = [0, 0], sizes = [16, 256], strides = [1, 1]} : vector<16x512xf32> to vector<16x256xf32>
    %cst_70 = arith.constant 0.000000e+00 : f32
    %179 = vector.broadcast %cst_70 : f32 to vector<16x256xf32>
    %180 = arith.subf %179, %178 : vector<16x256xf32>
    %181 = math.exp %180 : vector<16x256xf32>
    %cst_71 = arith.constant 1.000000e+00 : f32
    %182 = vector.broadcast %cst_71 : f32 to vector<16x256xf32>
    %183 = arith.addf %182, %181 : vector<16x256xf32>
    %184 = tpu.reciprocal %183 {approx = true} : vector<16x256xf32> -> vector<16x256xf32>
    %185 = vector.extract_strided_slice %184 {offsets = [0, 0], sizes = [16, 128], strides = [1, 1]} : vector<16x256xf32> to vector<16x128xf32>
    %186 = vector.extract_strided_slice %184 {offsets = [0, 128], sizes = [16, 128], strides = [1, 1]} : vector<16x256xf32> to vector<16x128xf32>
    %187 = vector.extract_strided_slice %177 {offsets = [0, 256], sizes = [16, 128], strides = [1, 1]} : vector<16x512xf32> to vector<16x128xf32>
    %188 = math.tanh %187 : vector<16x128xf32>
    %189 = vector.extract_strided_slice %177 {offsets = [0, 384], sizes = [16, 128], strides = [1, 1]} : vector<16x512xf32> to vector<16x128xf32>
    %cst_72 = arith.constant 0.000000e+00 : f32
    %190 = vector.broadcast %cst_72 : f32 to vector<16x128xf32>
    %191 = arith.subf %190, %189 : vector<16x128xf32>
    %192 = math.exp %191 : vector<16x128xf32>
    %cst_73 = arith.constant 1.000000e+00 : f32
    %193 = vector.broadcast %cst_73 : f32 to vector<16x128xf32>
    %194 = arith.addf %193, %192 : vector<16x128xf32>
    %195 = tpu.reciprocal %194 {approx = true} : vector<16x128xf32> -> vector<16x128xf32>
    %196 = arith.mulf %186, %171 : vector<16x128xf32>
    %197 = arith.mulf %185, %188 : vector<16x128xf32>
    %198 = arith.addf %196, %197 : vector<16x128xf32>
    %199 = math.tanh %198 : vector<16x128xf32>
    %200 = arith.mulf %195, %199 : vector<16x128xf32>
    %c0_74 = arith.constant 0 : index
    %c3072_75 = arith.constant 3072 : index
    %201 = vector.load %arg8[%c0_74, %c3072_75] : memref<16x4096xf32, #tpu.memory_space<vmem>>, vector<16x512xf32>
    %202 = arith.truncf %200 : vector<16x128xf32> to vector<16x128xbf16>
    %cst_76 = arith.constant dense<0.000000e+00> : vector<16x512xf32>
    %203 = tpu.matmul %202, %36, %cst_76 {dimension_numbers = #tpu.dot_dimension_numbers<[1], [0], [0], [1], [0, 0, 1, 1], [], []>} : vector<16x128xbf16>, vector<128x512xbf16>, vector<16x512xf32> -> vector<16x512xf32>
    %204 = arith.addf %201, %203 : vector<16x512xf32>
    %205 = vector.extract_strided_slice %204 {offsets = [0, 0], sizes = [16, 256], strides = [1, 1]} : vector<16x512xf32> to vector<16x256xf32>
    %cst_77 = arith.constant 0.000000e+00 : f32
    %206 = vector.broadcast %cst_77 : f32 to vector<16x256xf32>
    %207 = arith.subf %206, %205 : vector<16x256xf32>
    %208 = math.exp %207 : vector<16x256xf32>
    %cst_78 = arith.constant 1.000000e+00 : f32
    %209 = vector.broadcast %cst_78 : f32 to vector<16x256xf32>
    %210 = arith.addf %209, %208 : vector<16x256xf32>
    %211 = tpu.reciprocal %210 {approx = true} : vector<16x256xf32> -> vector<16x256xf32>
    %212 = vector.extract_strided_slice %211 {offsets = [0, 0], sizes = [16, 128], strides = [1, 1]} : vector<16x256xf32> to vector<16x128xf32>
    %213 = vector.extract_strided_slice %211 {offsets = [0, 128], sizes = [16, 128], strides = [1, 1]} : vector<16x256xf32> to vector<16x128xf32>
    %214 = vector.extract_strided_slice %204 {offsets = [0, 256], sizes = [16, 128], strides = [1, 1]} : vector<16x512xf32> to vector<16x128xf32>
    %215 = math.tanh %214 : vector<16x128xf32>
    %216 = vector.extract_strided_slice %204 {offsets = [0, 384], sizes = [16, 128], strides = [1, 1]} : vector<16x512xf32> to vector<16x128xf32>
    %cst_79 = arith.constant 0.000000e+00 : f32
    %217 = vector.broadcast %cst_79 : f32 to vector<16x128xf32>
    %218 = arith.subf %217, %216 : vector<16x128xf32>
    %219 = math.exp %218 : vector<16x128xf32>
    %cst_80 = arith.constant 1.000000e+00 : f32
    %220 = vector.broadcast %cst_80 : f32 to vector<16x128xf32>
    %221 = arith.addf %220, %219 : vector<16x128xf32>
    %222 = tpu.reciprocal %221 {approx = true} : vector<16x128xf32> -> vector<16x128xf32>
    %223 = arith.mulf %213, %198 : vector<16x128xf32>
    %224 = arith.mulf %212, %215 : vector<16x128xf32>
    %225 = arith.addf %223, %224 : vector<16x128xf32>
    %226 = math.tanh %225 : vector<16x128xf32>
    %227 = arith.mulf %222, %226 : vector<16x128xf32>
    %c0_81 = arith.constant 0 : index
    %c3584_82 = arith.constant 3584 : index
    %228 = vector.load %arg8[%c0_81, %c3584_82] : memref<16x4096xf32, #tpu.memory_space<vmem>>, vector<16x512xf32>
    %229 = arith.truncf %227 : vector<16x128xf32> to vector<16x128xbf16>
    %cst_83 = arith.constant dense<0.000000e+00> : vector<16x512xf32>
    %230 = tpu.matmul %229, %36, %cst_83 {dimension_numbers = #tpu.dot_dimension_numbers<[1], [0], [0], [1], [0, 0, 1, 1], [], []>} : vector<16x128xbf16>, vector<128x512xbf16>, vector<16x512xf32> -> vector<16x512xf32>
    %231 = arith.addf %228, %230 : vector<16x512xf32>
    %232 = vector.extract_strided_slice %231 {offsets = [0, 0], sizes = [16, 256], strides = [1, 1]} : vector<16x512xf32> to vector<16x256xf32>
    %cst_84 = arith.constant 0.000000e+00 : f32
    %233 = vector.broadcast %cst_84 : f32 to vector<16x256xf32>
    %234 = arith.subf %233, %232 : vector<16x256xf32>
    %235 = math.exp %234 : vector<16x256xf32>
    %cst_85 = arith.constant 1.000000e+00 : f32
    %236 = vector.broadcast %cst_85 : f32 to vector<16x256xf32>
    %237 = arith.addf %236, %235 : vector<16x256xf32>
    %238 = tpu.reciprocal %237 {approx = true} : vector<16x256xf32> -> vector<16x256xf32>
    %239 = vector.extract_strided_slice %238 {offsets = [0, 0], sizes = [16, 128], strides = [1, 1]} : vector<16x256xf32> to vector<16x128xf32>
    %240 = vector.extract_strided_slice %238 {offsets = [0, 128], sizes = [16, 128], strides = [1, 1]} : vector<16x256xf32> to vector<16x128xf32>
    %241 = vector.extract_strided_slice %231 {offsets = [0, 256], sizes = [16, 128], strides = [1, 1]} : vector<16x512xf32> to vector<16x128xf32>
    %242 = math.tanh %241 : vector<16x128xf32>
    %243 = vector.extract_strided_slice %231 {offsets = [0, 384], sizes = [16, 128], strides = [1, 1]} : vector<16x512xf32> to vector<16x128xf32>
    %cst_86 = arith.constant 0.000000e+00 : f32
    %244 = vector.broadcast %cst_86 : f32 to vector<16x128xf32>
    %245 = arith.subf %244, %243 : vector<16x128xf32>
    %246 = math.exp %245 : vector<16x128xf32>
    %cst_87 = arith.constant 1.000000e+00 : f32
    %247 = vector.broadcast %cst_87 : f32 to vector<16x128xf32>
    %248 = arith.addf %247, %246 : vector<16x128xf32>
    %249 = tpu.reciprocal %248 {approx = true} : vector<16x128xf32> -> vector<16x128xf32>
    %250 = arith.mulf %240, %225 : vector<16x128xf32>
    %251 = arith.mulf %239, %242 : vector<16x128xf32>
    %252 = arith.addf %250, %251 : vector<16x128xf32>
    %253 = math.tanh %252 : vector<16x128xf32>
    %254 = arith.mulf %249, %253 : vector<16x128xf32>
    %c0_88 = arith.constant 0 : index
    %c0_89 = arith.constant 0 : index
    %255 = vector.load %arg5[%c0_88, %c0_89] : memref<1x128xf32, #tpu.memory_space<vmem>>, vector<1x128xf32>
    %256 = vector.broadcast %255 : vector<1x128xf32> to vector<16x128xf32>
    %257 = arith.mulf %254, %256 : vector<16x128xf32>
    %cst_90 = arith.constant dense<0.000000e+00> : vector<16xf32>
    %258 = vector.multi_reduction <add>, %257, %cst_90 [1] : vector<16x128xf32> to vector<16xf32>
    %259 = vector.shape_cast %258 : vector<16xf32> to vector<16x1xf32>
    %c0_91 = arith.constant 0 : index
    %c0_92 = arith.constant 0 : index
    %260 = memref.load %arg6[%c0_91, %c0_92] : memref<1x1xf32, #tpu.memory_space<smem>>
    %261 = vector.broadcast %260 : f32 to vector<16x1xf32>
    %262 = arith.addf %259, %261 : vector<16x1xf32>
    %cst_93 = arith.constant 0.000000e+00 : f32
    %263 = vector.broadcast %cst_93 : f32 to vector<16x1xf32>
    %264 = arith.subf %263, %262 : vector<16x1xf32>
    %265 = math.exp %264 : vector<16x1xf32>
    %cst_94 = arith.constant 1.000000e+00 : f32
    %266 = vector.broadcast %cst_94 : f32 to vector<16x1xf32>
    %267 = arith.addf %266, %265 : vector<16x1xf32>
    %268 = tpu.reciprocal %267 {approx = true} : vector<16x1xf32> -> vector<16x1xf32>
    %c0_95 = arith.constant 0 : index
    %c0_96 = arith.constant 0 : index
    %269 = vector.load %arg7[%c0_95, %c0_96] : memref<16x1xf32, #tpu.memory_space<vmem>>, vector<16x1xf32>
    tpu.vector_store %arg7[%c0_95, %c0_96], %268 {strides = array<i32>} : memref<16x1xf32, #tpu.memory_space<vmem>>, vector<16x1xf32>,
    return
  }
  func.func @transform_0(%arg0: i32) -> (i32, i32) {
    %c0_i32 = arith.constant 0 : i32
    %c0_i32_0 = arith.constant 0 : i32
    return %arg0, %c0_i32 : i32, i32
  }
  func.func @transform_1(%arg0: i32) -> (i32, i32) {
    %c0_i32 = arith.constant 0 : i32
    %c0_i32_0 = arith.constant 0 : i32
    %c0_i32_1 = arith.constant 0 : i32
    return %c0_i32, %c0_i32_0 : i32, i32
  }
  func.func @transform_2(%arg0: i32) -> (i32, i32) {
    %c0_i32 = arith.constant 0 : i32
    %c0_i32_0 = arith.constant 0 : i32
    %c0_i32_1 = arith.constant 0 : i32
    return %c0_i32, %c0_i32_0 : i32, i32
  }
  func.func @transform_3(%arg0: i32) -> (i32, i32) {
    %c0_i32 = arith.constant 0 : i32
    %c0_i32_0 = arith.constant 0 : i32
    %c0_i32_1 = arith.constant 0 : i32
    return %c0_i32, %c0_i32_0 : i32, i32
  }
  func.func @transform_4(%arg0: i32) -> (i32, i32) {
    %c0_i32 = arith.constant 0 : i32
    %c0_i32_0 = arith.constant 0 : i32
    %c0_i32_1 = arith.constant 0 : i32
    return %c0_i32, %c0_i32_0 : i32, i32
  }
  func.func @transform_5(%arg0: i32) -> (i32, i32) {
    %c0_i32 = arith.constant 0 : i32
    %c0_i32_0 = arith.constant 0 : i32
    %c0_i32_1 = arith.constant 0 : i32
    return %c0_i32, %c0_i32_0 : i32, i32
  }
  func.func @transform_6(%arg0: i32) -> (i32, i32) {
    %c0_i32 = arith.constant 0 : i32
    %c0_i32_0 = arith.constant 0 : i32
    return %arg0, %c0_i32 : i32, i32
  }
}

</mosaic_0001>

<bundles_post_ra>
// kernel: tpu_custom_call.1
= control target key start
LH: loop header
LB: loop body
LE: loop exit
PB: predicated region body
PF: predicated region fallthrough
CT: control target
= control target key end

     0   :  { %12 = vsyncpa [#allocation5], 0  ;;  %s3329_s0 = inlined_call_operand.hbm [shape: bf16[16,256], index: 0, kind: input, shape index: {}]   ;;  %s3330_s1 = inlined_call_operand.hbm [shape: bf16[32,512], index: 1, kind: input, shape index: {}]   ;;  %s3331_s2 = inlined_call_operand.hbm [shape: bf16[128,512], index: 2, kind: input, shape index: {}]   ;;  %s3332_s3 = inlined_call_operand.vmem [shape: f32[1,512], index: 3, kind: input, shape index: {}]   ;;  %s3333_s4 = inlined_call_operand.vmem [shape: f32[1,128], index: 4, kind: input, shape index: {}]   ;;  %s3334_s5 = inlined_call_operand.<no memory space> [shape: f32[1,1], index: 5, kind: input, shape index: {}]   ;;  %s3335_s6 = inlined_call_operand.vmem [shape: f32[16,1], index: 6, kind: output, shape index: {}]  }
   0x1   :  { %13 = vsyncpa [#allocation7], 0  ;;  %s31_s23 = sshll.u32 %s3330_s1, 4  ;;  %s2503_s24 = smov [#allocation6]   ;;  %s32_s23 = int_to_ptr.hbm [resolvable:$true] %s31_s23 }
   0x2   :  { %s33_s25 = sshll.u32 %s2503_s24, 4  ;;  %s18_s28 = sshll.u32 %s3329_s0, 4  ;;  %s34_s25 = int_to_ptr.vmem [resolvable:$true] %s33_s25  ;;  %s19_s28 = int_to_ptr.hbm [resolvable:$true] %s18_s28 }
   0x3   :  { %s2504_s29 = smov 256   ;;  %s2505_s30 = smov 16  }
   0x4   :  { %39 = dma.hbm_to_vmem [thread:$0]  %s32_s23, 1024, %s34_s25, [#allocation7], %s2504_s29, %s2504_s29, %s2505_s30  }
   0x5   :  { %s2506_s7 = smov [#allocation4]   ;;  %s2507_s9 = smov 128  }
   0x6   :  { %s20_s8 = sshll.u32 %s2506_s7, 4  ;;  %s2508_s10 = smov 8   ;;  %s21_s8 = int_to_ptr.vmem [resolvable:$true] %s20_s8 }
   0x7   :  { %26 = dma.hbm_to_vmem [thread:$0]  %s19_s28, 256, %s21_s8, [#allocation5], %s2507_s9, %s2507_s9, %s2508_s10  }
   0x8   :  { %s44_s12 = sshll.u32 %s3331_s2, 4  ;;  %s2509_s13 = smov [#allocation8]   ;;  %s45_s12 = int_to_ptr.hbm [resolvable:$true] %s44_s12 }
   0x9   :  { %s46_s14 = sshll.u32 %s2509_s13, 4  ;;  %s47_s14 = int_to_ptr.vmem [resolvable:$true] %s46_s14 }
   0xa   :  { %52 = dma.hbm_to_vmem [thread:$0]  %s45_s12, 4096, %s47_s14, [#allocation7], %s2504_s29, %s2504_s29, %s2505_s30  }
   0xb   :  { %2499 = dma.done.wait [#allocation5], 256  }
   0xc   :  { %2500 = vsyncadd [#allocation5], 4294967040 }
   0xd   :  { %2501 = dma.done.wait [#allocation7], 5120  }
   0xe   :  { %2502 = vsyncadd [#allocation7], 4294962176  ;;  %v1921_v0 = vld [vmem:[#allocation4] sm:$0xf]  ;;  %v2112_v1 = vld [vmem:[#allocation4 + $0x4] sm:$0xf0] }
   0xf   :  { %v1922_v2 = vor.u32 %v2112_v1, %v1921_v0  ;;  %v1937_v3 = vld [vmem:[#allocation4] sm:$0xf]  ;;  %v2114_v4 = vld [vmem:[#allocation4 + $0x4] sm:$0xf0]  ;;  %v1901_v8 = vld [vmem:[#allocation6 + $0x20] sm:$0xf] }
  0x10   :  { %v1929_v5 = vld [vmem:[#allocation4] sm:$0xf]  ;;  %v2113_v6 = vld [vmem:[#allocation4 + $0x4] sm:$0xf0]  ;;  %v1938_v7 = vor.u32 %v2114_v4, %v1937_v3  ;;  %s2510_s0 = smov 96   ;;  %s2511_s2 = smov 32  }
  0x11   :  { %212 = vrot.lane.b32.xlu0 %v1922_v2, %s2510_s0  ;;  %v1953_v9 = vld [vmem:[#allocation4 + $0x4] sm:$0xf]  ;;  %v2116_v10 = vld [vmem:[#allocation4 + $0x8] sm:$0xf0]  ;;  %v2109_v11 = vld [vmem:[#allocation6 + $0x2c] sm:$0xf0]  ;;  %v1930_v28 = vor.u32 %v2113_v6, %v1929_v5 }
  0x12   :  { %v2107_v12 = vld [vmem:[#allocation6 + $0x24] sm:$0xf]  ;;  %v1903_v13 = vld [vmem:[#allocation6 + $0x30] sm:$0xf0]  ;;  %364 = vrot.lane.b32.xlu1 %v1938_v7, %s2511_s2  ;;  %v2560_v14 = vor.u32 %v2109_v11, %v1901_v8  ;;  %v1885_v16 = vld [vmem:[#allocation6] sm:$0xf]  ;;  %v1954_v32 = vor.u32 %v2116_v10, %v1953_v9 }
  0x13   :  { %v2562_v15 = vor.u32 %v2107_v12, %v1903_v13  ;;  %v2105_v17 = vld [vmem:[#allocation6 + $0xc] sm:$0xf0]  ;;  %v2103_v18 = vld [vmem:[#allocation6 + $0x4] sm:$0xf]  ;;  %v1887_v19 = vld [vmem:[#allocation6 + $0x10] sm:$0xf0] }
  0x14   :  { %v2108_v20 = vld [vmem:[#allocation6 + $0x2c] sm:$0xf]  ;;  %v1911_v21 = vld [vmem:[#allocation6 + $0x38] sm:$0xf0]  ;;  %147 = vmatpush.bf16.msra.mxu0 %v2560_v14  ;;  %v2566_v22 = vor.u32 %v2105_v17, %v1885_v16  ;;  %v2568_v23 = vor.u32 %v2103_v18, %v1887_v19  ;;  %v1881_v25 = vld [vmem:[#allocation4] sm:$0xf] }
  0x15   :  { %161 = vmatpush.bf16.msra.mxu1 %v2562_v15  ;;  %v2570_v24 = vor.u32 %v2108_v20, %v1911_v21  ;;  %v2111_v26 = vld [vmem:[#allocation4 + $0x4] sm:$0xf0]  ;;  %v1909_v27 = vld [vmem:[#allocation6 + $0x28] sm:$0xf]  ;;  %v2104_v30 = vld [vmem:[#allocation6 + $0xc] sm:$0xf] }
  0x16   :  { %v2110_v29 = vld [vmem:[#allocation6 + $0x34] sm:$0xf0]  ;;  %v1895_v31 = vld [vmem:[#allocation6 + $0x18] sm:$0xf0]  ;;  %v1893_v35 = vld [vmem:[#allocation6 + $0x8] sm:$0xf]  ;;  %v1882_v37 = vor.u32 %v2111_v26, %v1881_v25 }
  0x17   :  { %189 = vmatpush.bf16.msra.mxu3 %v2570_v24  ;;  %v2573_v33 = vor.u32 %v2110_v29, %v1909_v27  ;;  %v2575_v34 = vor.u32 %v2104_v30, %v1895_v31  ;;  %v2106_v36 = vld [vmem:[#allocation6 + $0x14] sm:$0xf0]  ;;  %v1961_v38 = vld [vmem:[#allocation4 + $0x4] sm:$0xf]  ;;  %v2117_v39 = vld [vmem:[#allocation4 + $0x8] sm:$0xf0] }
  0x18   :  { %148 = vmatpush.bf16.msra.mxu0 %v2566_v22  ;;  %vm137_vm0 = vcmask 261120   ;;  %s2512_s15 = smov 64   ;;  %v2580_v40 = vor.u32 %v2106_v36, %v1893_v35  ;;  %v1962_v41 = vor.u32 %v2117_v39, %v1961_v38  ;;  %v1969_v42 = vld [vmem:[#allocation4 + $0x4] sm:$0xf]  ;;  %v2118_v43 = vld [vmem:[#allocation4 + $0x8] sm:$0xf0] }
  0x19   :  { %162 = vmatpush.bf16.msra.mxu1 %v2568_v23  ;;  %288 = vrot.lane.b32.xlu0 %v1930_v28, %s2512_s15  ;;  %v1970_v44 = vor.u32 %v2118_v43, %v1969_v42  ;;  %v1945_v48 = vld [vmem:[#allocation4 + $0x4] sm:$0xf]  ;;  %v2115_v49 = vld [vmem:[#allocation4 + $0x8] sm:$0xf0]  ;;  %v2089_v52 = vld [vmem:[#allocation8 + $0xe0] sm:$0xf] }
  0x1a   :  { %175 = vmatpush.bf16.msra.mxu2 %v2573_v33  ;;  %514 = vrot.lane.b32.xlu1 %v1954_v32, %s2510_s0  ;;  %v1946_v50 = vor.u32 %v2115_v49, %v1945_v48  ;;  %v2149_v53 = vld [vmem:[#allocation8 + $0xec] sm:$0xf0]  ;;  %v2147_v54 = vld [vmem:[#allocation8 + $0xe4] sm:$0xf]  ;;  %v2091_v55 = vld [vmem:[#allocation8 + $0xf0] sm:$0xf0] }
  0x1b   :  { %190 = vmatpush.bf16.msra.mxu3 %v2575_v34  ;;  %1915 = vmatmul.msk.bf16.vlgmr.msra.gmra.mxu0 %vm137_vm0, %v1882_v37  ;;  %v2097_v56 = vld [vmem:[#allocation8 + $0xe8] sm:$0xf]  ;;  %v2150_v57 = vld [vmem:[#allocation8 + $0xf4] sm:$0xf0]  ;;  %v2148_v58 = vld [vmem:[#allocation8 + $0xec] sm:$0xf]  ;;  %v2666_v61 = vor.u32 %v2149_v53, %v2089_v52  ;;  %v2668_v62 = vor.u32 %v2147_v54, %v2091_v55 }
  0x1c   :  { %1916 = vmatmul.msk.bf16.vlgmr.msra.gmra.mxu1 %vm137_vm0, %v1882_v37  ;;  %223 = vmatpush.bf16.msrb.mxu0 %v2560_v14  ;;  %v2099_v59 = vld [vmem:[#allocation8 + $0xf8] sm:$0xf0]  ;;  %v2073_v63 = vld [vmem:[#allocation8 + $0xc0] sm:$0xf]  ;;  %v2145_v0 = vld [vmem:[#allocation8 + $0xcc] sm:$0xf0]  ;;  %v2670_v1 = vor.u32 %v2150_v57, %v2097_v56 }
  0x1d   :  { %237 = vmatpush.bf16.msrb.mxu1 %v2562_v15  ;;  %590 = vrot.lane.b32.xlu2 %v1962_v41, %s2512_s15  ;;  %v2672_v2 = vor.u32 %v2148_v58, %v2099_v59  ;;  %v2143_v3 = vld [vmem:[#allocation8 + $0xc4] sm:$0xf]  ;;  %v2075_v4 = vld [vmem:[#allocation8 + $0xd0] sm:$0xf0]  ;;  %v2081_v5 = vld [vmem:[#allocation8 + $0xc8] sm:$0xf]  ;;  %v2680_v9 = vor.u32 %v2145_v0, %v2073_v63 }
  0x1e   :  { %176 = vmatpush.bf16.msra.mxu2 %v2580_v40  ;;  %1918 = vmatmul.msk.bf16.vlgmr.msra.gmra.mxu3 %vm137_vm0, %v1882_v37  ;;  %v2146_v6 = vld [vmem:[#allocation8 + $0xd4] sm:$0xf0]  ;;  %v2144_v7 = vld [vmem:[#allocation8 + $0xcc] sm:$0xf]  ;;  %v2083_v8 = vld [vmem:[#allocation8 + $0xd8] sm:$0xf0]  ;;  %v2682_v10 = vor.u32 %v2143_v3, %v2075_v4 }
  0x1f   :  { %265 = vmatpush.bf16.msrb.mxu3 %v2570_v24  ;;  %v2057_v11 = vld [vmem:[#allocation8 + $0xa0] sm:$0xf]  ;;  %v2141_v12 = vld [vmem:[#allocation8 + $0xac] sm:$0xf0]  ;;  %v2686_v13 = vor.u32 %v2146_v6, %v2081_v5  ;;  %v2059_v16 = vld [vmem:[#allocation8 + $0xb0] sm:$0xf0] }
  0x20   :  { %224 = vmatpush.bf16.msrb.mxu0 %v2566_v22  ;;  %v2065_v17 = vld [vmem:[#allocation8 + $0xa8] sm:$0xf]  ;;  %v2142_v18 = vld [vmem:[#allocation8 + $0xb4] sm:$0xf0]  ;;  %v2140_v19 = vld [vmem:[#allocation8 + $0xac] sm:$0xf]  ;;  %v2692_v21 = vor.u32 %v2141_v12, %v2057_v11 }
  0x21   :  { %1917 = vmatmul.msk.bf16.vlgmr.msra.gmra.mxu2 %vm137_vm0, %v1882_v37  ;;  %238 = vmatpush.bf16.msrb.mxu1 %v2568_v23  ;;  %v2067_v20 = vld [vmem:[#allocation8 + $0xb8] sm:$0xf0]  ;;  %v2698_v25 = vor.u32 %v2142_v18, %v2065_v17  ;;  %v2135_v27 = vld [vmem:[#allocation8 + $0x84] sm:$0xf]  ;;  %v2043_v28 = vld [vmem:[#allocation8 + $0x90] sm:$0xf0] }
  0x22   :  { %251 = vmatpush.bf16.msrb.mxu2 %v2573_v33  ;;  %v2700_v26 = vor.u32 %v2140_v19, %v2067_v20  ;;  %v2049_v29 = vld [vmem:[#allocation8 + $0x88] sm:$0xf]  ;;  %v2138_v30 = vld [vmem:[#allocation8 + $0x94] sm:$0xf0]  ;;  %v2136_v31 = vld [vmem:[#allocation8 + $0x8c] sm:$0xf] }
  0x23   :  { %266 = vmatpush.bf16.msrb.mxu3 %v2575_v34  ;;  %v2051_v32 = vld [vmem:[#allocation8 + $0x98] sm:$0xf0]  ;;  %v2025_v35 = vld [vmem:[#allocation8 + $0x60] sm:$0xf]  ;;  %v2133_v36 = vld [vmem:[#allocation8 + $0x6c] sm:$0xf0]  ;;  %v2710_v37 = vor.u32 %v2138_v30, %v2049_v29 }
  0x24   :  { %299 = vmatpush.bf16.msra.mxu0 %v2560_v14  ;;  %v2712_v38 = vor.u32 %v2136_v31, %v2051_v32  ;;  %v2131_v39 = vld [vmem:[#allocation8 + $0x64] sm:$0xf]  ;;  %v2033_v41 = vld [vmem:[#allocation8 + $0x68] sm:$0xf]  ;;  %v2134_v42 = vld [vmem:[#allocation8 + $0x74] sm:$0xf0] }
  0x25   :  { %313 = vmatpush.bf16.msra.mxu1 %v2562_v15  ;;  %666 = vrot.lane.b32.xlu2 %v1970_v44, %s2511_s2  ;;  %v2132_v43 = vld [vmem:[#allocation8 + $0x6c] sm:$0xf]  ;;  %v2035_v44 = vld [vmem:[#allocation8 + $0x78] sm:$0xf0]  ;;  %v2009_v48 = vld [vmem:[#allocation8 + $0x40] sm:$0xf] }
  0x26   :  { %252 = vmatpush.bf16.msrb.mxu2 %v2580_v40  ;;  %v2129_v49 = vld [vmem:[#allocation8 + $0x4c] sm:$0xf0]  ;;  %v2127_v52 = vld [vmem:[#allocation8 + $0x44] sm:$0xf]  ;;  %v2011_v53 = vld [vmem:[#allocation8 + $0x50] sm:$0xf0] }
  0x27   :  { %341 = vmatpush.bf16.msra.mxu3 %v2570_v24  ;;  %v2017_v54 = vld [vmem:[#allocation8 + $0x48] sm:$0xf]  ;;  %v2130_v55 = vld [vmem:[#allocation8 + $0x54] sm:$0xf0]  ;;  %v2128_v56 = vld [vmem:[#allocation8 + $0x4c] sm:$0xf]  ;;  %v2732_v58 = vor.u32 %v2129_v49, %v2009_v48  ;;  %v2734_v59 = vor.u32 %v2127_v52, %v2011_v53 }
  0x28   :  { %300 = vmatpush.bf16.msra.mxu0 %v2566_v22  ;;  %v2019_v57 = vld [vmem:[#allocation8 + $0x58] sm:$0xf0]  ;;  %v2125_v63 = vld [vmem:[#allocation8 + $0x2c] sm:$0xf0]  ;;  %v2738_v0 = vor.u32 %v2130_v55, %v2017_v54  ;;  %v2123_v4 = vld [vmem:[#allocation8 + $0x24] sm:$0xf] }
  0x29   :  { %314 = vmatpush.bf16.msra.mxu1 %v2568_v23  ;;  %v2740_v3 = vor.u32 %v2128_v56, %v2019_v57  ;;  %v1995_v5 = vld [vmem:[#allocation8 + $0x30] sm:$0xf0]  ;;  %v2001_v6 = vld [vmem:[#allocation8 + $0x28] sm:$0xf]  ;;  %v2003_v11 = vld [vmem:[#allocation8 + $0x38] sm:$0xf0] }
  0x2a   :  { %327 = vmatpush.bf16.msra.mxu2 %v2573_v33  ;;  %v2121_v17 = vld [vmem:[#allocation8 + $0xc] sm:$0xf0]  ;;  %v2119_v20 = vld [vmem:[#allocation8 + $0x4] sm:$0xf]  ;;  %v1987_v29 = vld [vmem:[#allocation8 + $0x18] sm:$0xf0] }
  0x2b   :  { %342 = vmatpush.bf16.msra.mxu3 %v2575_v34  ;;  %vm1870_vm1 = vcmask 7168  }
  0x2e   :  { %328 = vmatpush.bf16.msra.mxu2 %v2580_v40 }
  0x77   :  { %v591_v60 = vpop.permute.xlu2 %590 }
  0x83   :  { %v213_v45 = vpop.permute.xlu0 %212 }
  0x84   :  { %1923 = vmatmul.msk.bf16.vlgmr.msrb.gmra.mxu0 %vm137_vm0, %v213_v45  ;;  %1924 = vmatmul.msk.bf16.vlgmr.msrb.gmra.mxu1 %vm137_vm0, %v213_v45  ;;  %v365_v47 = vpop.permute.xlu1 %364 }
  0x85   :  { %1925 = vmatmul.msk.bf16.vlgmr.msrb.gmra.mxu2 %vm137_vm0, %v213_v45  ;;  %1926 = vmatmul.msk.bf16.vlgmr.msrb.gmra.mxu3 %vm137_vm0, %v213_v45  ;;  %v667_v45 = vpop.permute.xlu2 %666 }
  0x86   :  { %375 = vmatpush.bf16.msrb.mxu0 %v2560_v14  ;;  %389 = vmatpush.bf16.msrb.mxu1 %v2562_v15 }
  0x87   :  { %417 = vmatpush.bf16.msrb.mxu3 %v2570_v24  ;;  %403 = vmatpush.bf16.msrb.mxu2 %v2573_v33 }
  0x8a   :  { %376 = vmatpush.bf16.msrb.mxu0 %v2566_v22  ;;  %390 = vmatpush.bf16.msrb.mxu1 %v2568_v23 }
  0x8b   :  { %404 = vmatpush.bf16.msrb.mxu2 %v2580_v40  ;;  %418 = vmatpush.bf16.msrb.mxu3 %v2575_v34  ;;  %v289_v46 = vpop.permute.xlu0 %288 }
  0x8c   :  { %v515_v51 = vpop.permute.xlu1 %514 }
  0x94   :  { %1931 = vmatmul.msk.bf16.vlgmr.msra.gmra.mxu0 %vm137_vm0, %v289_v46  ;;  %1932 = vmatmul.msk.bf16.vlgmr.msra.gmra.mxu1 %vm137_vm0, %v289_v46 }
  0x95   :  { %1933 = vmatmul.msk.bf16.vlgmr.msra.gmra.mxu2 %vm137_vm0, %v289_v46  ;;  %1934 = vmatmul.msk.bf16.vlgmr.msra.gmra.mxu3 %vm137_vm0, %v289_v46  ;;  %v2716_v46 = vor.u32 %v2133_v36, %v2025_v35 }
  0x96   :  { %449 = vmatpush.bf16.msra.mxu0 %v2560_v14  ;;  %463 = vmatpush.bf16.msra.mxu1 %v2562_v15 }
  0x97   :  { %491 = vmatpush.bf16.msra.mxu3 %v2570_v24  ;;  %477 = vmatpush.bf16.msra.mxu2 %v2573_v33 }
  0x98   :  { %v2760_v32 = vpop.f32.mrf.mxu0 }
  0x99   :  { %v2762_v35 = vpop.f32.mrf.mxu1 }
  0x9a   :  { %450 = vmatpush.bf16.msra.mxu0 %v2566_v22  ;;  %464 = vmatpush.bf16.msra.mxu1 %v2568_v23 }
  0x9b   :  { %478 = vmatpush.bf16.msra.mxu2 %v2580_v40  ;;  %492 = vmatpush.bf16.msra.mxu3 %v2575_v34 }
  0xa4   :  { %1939 = vmatmul.msk.bf16.vlgmr.msrb.gmra.mxu0 %vm137_vm0, %v365_v47  ;;  %1940 = vmatmul.msk.bf16.vlgmr.msrb.gmra.mxu1 %vm137_vm0, %v365_v47 }
  0xa5   :  { %1941 = vmatmul.msk.bf16.vlgmr.msrb.gmra.mxu2 %vm137_vm0, %v365_v47  ;;  %1942 = vmatmul.msk.bf16.vlgmr.msrb.gmra.mxu3 %vm137_vm0, %v365_v47 }
  0xa6   :  { %525 = vmatpush.bf16.msrb.mxu0 %v2560_v14  ;;  %539 = vmatpush.bf16.msrb.mxu1 %v2562_v15 }
  0xa7   :  { %567 = vmatpush.bf16.msrb.mxu3 %v2570_v24  ;;  %553 = vmatpush.bf16.msrb.mxu2 %v2573_v33 }
  0xaa   :  { %526 = vmatpush.bf16.msrb.mxu0 %v2566_v22  ;;  %540 = vmatpush.bf16.msrb.mxu1 %v2568_v23 }
  0xab   :  { %554 = vmatpush.bf16.msrb.mxu2 %v2580_v40  ;;  %568 = vmatpush.bf16.msrb.mxu3 %v2575_v34 }
  0xb4   :  { %1947 = vmatmul.msk.bf16.vlgmr.msra.gmra.mxu0 %vm137_vm0, %v1946_v50  ;;  %1948 = vmatmul.msk.bf16.vlgmr.msra.gmra.mxu1 %vm137_vm0, %v1946_v50 }
  0xb5   :  { %1949 = vmatmul.msk.bf16.vlgmr.msra.gmra.mxu2 %vm137_vm0, %v1946_v50  ;;  %1950 = vmatmul.msk.bf16.vlgmr.msra.gmra.mxu3 %vm137_vm0, %v1946_v50  ;;  %v2722_v50 = vor.u32 %v2134_v42, %v2033_v41  ;;  %v2513_v41 = vmov 0   ;;  %v2778_v42 = vpop.f32.mrf.mxu3 }
  0xb6   :  { %601 = vmatpush.bf16.msra.mxu0 %v2560_v14  ;;  %615 = vmatpush.bf16.msra.mxu1 %v2562_v15 }
  0xb7   :  { %643 = vmatpush.bf16.msra.mxu3 %v2570_v24  ;;  %629 = vmatpush.bf16.msra.mxu2 %v2573_v33 }
  0xba   :  { %602 = vmatpush.bf16.msra.mxu0 %v2566_v22  ;;  %616 = vmatpush.bf16.msra.mxu1 %v2568_v23 }
  0xbb   :  { %630 = vmatpush.bf16.msra.mxu2 %v2580_v40  ;;  %644 = vmatpush.bf16.msra.mxu3 %v2575_v34 }
  0xbd   :  { %v2796_v48 = vpop.f32.mrf.mxu3 }
  0xc4   :  { %1955 = vmatmul.msk.bf16.vlgmr.msrb.gmra.mxu0 %vm137_vm0, %v515_v51  ;;  %1956 = vmatmul.msk.bf16.vlgmr.msrb.gmra.mxu1 %vm137_vm0, %v515_v51 }
  0xc5   :  { %1957 = vmatmul.msk.bf16.vlgmr.msrb.gmra.mxu2 %vm137_vm0, %v515_v51  ;;  %1958 = vmatmul.msk.bf16.vlgmr.msrb.gmra.mxu3 %vm137_vm0, %v515_v51  ;;  %v2724_v51 = vor.u32 %v2132_v43, %v2035_v44  ;;  %v2784_v43 = vpop.f32.mrf.mxu0  ;;  %v2786_v44 = vpop.f32.mrf.mxu1 }
  0xc6   :  { %677 = vmatpush.bf16.msrb.mxu0 %v2560_v14  ;;  %691 = vmatpush.bf16.msrb.mxu1 %v2562_v15  ;;  %v2688_v14 = vor.u32 %v2144_v7, %v2083_v8  ;;  %v2139_v15 = vld [vmem:[#allocation8 + $0xa4] sm:$0xf]  ;;  %v2126_v7 = vld [vmem:[#allocation8 + $0x34] sm:$0xf0]  ;;  %v2124_v8 = vld [vmem:[#allocation8 + $0x2c] sm:$0xf] }
  0xc7   :  { %705 = vmatpush.bf16.msrb.mxu2 %v2573_v33  ;;  %719 = vmatpush.bf16.msrb.mxu3 %v2570_v24  ;;  %v2137_v24 = vld [vmem:[#allocation8 + $0x8c] sm:$0xf0]  ;;  %v2750_v18 = vor.u32 %v2126_v7, %v2001_v6  ;;  %v2752_v19 = vor.u32 %v2124_v8, %v2003_v11 }
  0xca   :  { %678 = vmatpush.bf16.msrb.mxu0 %v2566_v22  ;;  %692 = vmatpush.bf16.msrb.mxu1 %v2568_v23  ;;  %v2694_v22 = vor.u32 %v2139_v15, %v2059_v16  ;;  %v2041_v23 = vld [vmem:[#allocation8 + $0x80] sm:$0xf]  ;;  %v2746_v15 = vor.u32 %v2123_v4, %v1995_v5 }
  0xcb   :  { %706 = vmatpush.bf16.msrb.mxu2 %v2580_v40  ;;  %720 = vmatpush.bf16.msrb.mxu3 %v2575_v34  ;;  %v2704_v33 = vor.u32 %v2137_v24, %v2041_v23  ;;  %v2706_v34 = vor.u32 %v2135_v27, %v2043_v28  ;;  %v2027_v40 = vld [vmem:[#allocation8 + $0x70] sm:$0xf0]  ;;  %v1977_v16 = vld [vmem:[#allocation8] sm:$0xf]  ;;  %v1985_v24 = vld [vmem:[#allocation8 + $0x8] sm:$0xf] }
  0xcc   :  { %v2718_v47 = vor.u32 %v2131_v39, %v2027_v40  ;;  %v1979_v23 = vld [vmem:[#allocation8 + $0x10] sm:$0xf0]  ;;  %v2122_v27 = vld [vmem:[#allocation8 + $0x14] sm:$0xf0]  ;;  %v2120_v28 = vld [vmem:[#allocation8 + $0xc] sm:$0xf]  ;;  %v2756_v30 = vor.u32 %v2121_v17, %v1977_v16  ;;  %v2774_v40 = vpop.f32.mrf.mxu2 }
  0xcd   :  { %v2758_v31 = vor.u32 %v2119_v20, %v1979_v23  ;;  %v2766_v36 = vor.u32 %v2122_v27, %v1985_v24  ;;  %v2768_v39 = vor.u32 %v2120_v28, %v1987_v29 }
  0xd4   :  { %1963 = vmatmul.msk.bf16.vlgmr.msra.gmra.mxu0 %vm137_vm0, %v591_v60  ;;  %1964 = vmatmul.msk.bf16.vlgmr.msra.gmra.mxu1 %vm137_vm0, %v591_v60 }
  0xd5   :  { %1965 = vmatmul.msk.bf16.vlgmr.msra.gmra.mxu2 %vm137_vm0, %v591_v60  ;;  %1966 = vmatmul.msk.bf16.vlgmr.msra.gmra.mxu3 %vm137_vm0, %v591_v60  ;;  %v1993_v60 = vld [vmem:[#allocation8 + $0x20] sm:$0xf] }
  0xd6   :  { %935 = vmatpush.bf16.msra.mxu0 %v2666_v61  ;;  %949 = vmatpush.bf16.msra.mxu1 %v2668_v62  ;;  %v2744_v12 = vor.u32 %v2125_v63, %v1993_v60 }
  0xd7   :  { %963 = vmatpush.bf16.msra.mxu2 %v2670_v1  ;;  %977 = vmatpush.bf16.msra.mxu3 %v2672_v2 }
  0xda   :  { %936 = vmatpush.bf16.msra.mxu0 %v2680_v9  ;;  %950 = vmatpush.bf16.msra.mxu1 %v2682_v10 }
  0xdb   :  { %964 = vmatpush.bf16.msra.mxu2 %v2686_v13  ;;  %978 = vmatpush.bf16.msra.mxu3 %v2688_v14 }
  0xde   :  { %937 = vmatpush.bf16.msra.mxu0 %v2692_v21  ;;  %951 = vmatpush.bf16.msra.mxu1 %v2694_v22 }
  0xdf   :  { %965 = vmatpush.bf16.msra.mxu2 %v2698_v25  ;;  %979 = vmatpush.bf16.msra.mxu3 %v2700_v26 }
  0xe2   :  { %938 = vmatpush.bf16.msra.mxu0 %v2704_v33  ;;  %952 = vmatpush.bf16.msra.mxu1 %v2706_v34 }
  0xe3   :  { %966 = vmatpush.bf16.msra.mxu2 %v2710_v37  ;;  %980 = vmatpush.bf16.msra.mxu3 %v2712_v38 }
  0xe4   :  { %1971 = vmatmul.msk.bf16.vlgmr.msrb.gmra.mxu0 %vm137_vm0, %v667_v45  ;;  %1972 = vmatmul.msk.bf16.vlgmr.msrb.gmra.mxu1 %vm137_vm0, %v667_v45 }
  0xe5   :  { %1973 = vmatmul.msk.bf16.vlgmr.msrb.gmra.mxu2 %vm137_vm0, %v667_v45  ;;  %1974 = vmatmul.msk.bf16.vlgmr.msrb.gmra.mxu3 %vm137_vm0, %v667_v45  ;;  %v2792_v45 = vpop.f32.mrf.mxu2 }
  0xe6   :  { %939 = vmatpush.bf16.msra.mxu0 %v2716_v46  ;;  %953 = vmatpush.bf16.msra.mxu1 %v2718_v47 }
  0xe7   :  { %967 = vmatpush.bf16.msra.mxu2 %v2722_v50  ;;  %981 = vmatpush.bf16.msra.mxu3 %v2724_v51 }
  0xea   :  { %940 = vmatpush.bf16.msra.mxu0 %v2732_v58  ;;  %954 = vmatpush.bf16.msra.mxu1 %v2734_v59 }
  0xeb   :  { %968 = vmatpush.bf16.msra.mxu2 %v2738_v0  ;;  %982 = vmatpush.bf16.msra.mxu3 %v2740_v3 }
  0xee   :  { %941 = vmatpush.bf16.msra.mxu0 %v2744_v12  ;;  %955 = vmatpush.bf16.msra.mxu1 %v2746_v15 }
  0xef   :  { %969 = vmatpush.bf16.msra.mxu2 %v2750_v18  ;;  %983 = vmatpush.bf16.msra.mxu3 %v2752_v19 }
  0xf2   :  { %942 = vmatpush.bf16.msra.mxu0 %v2756_v30  ;;  %956 = vmatpush.bf16.msra.mxu1 %v2758_v31 }
  0xf3   :  { %970 = vmatpush.bf16.msra.mxu2 %v2766_v36  ;;  %984 = vmatpush.bf16.msra.mxu3 %v2768_v39 }
  0xf5   :  { %943 = vmatmul.bf16.vlgmr.msra.gmra.mxu0 %v2513_v41  ;;  %957 = vmatmul.bf16.vlgmr.msra.gmra.mxu1 %v2513_v41 }
  0xf6   :  { %1050 = vmatpush.bf16.msrb.mxu0 %v2666_v61  ;;  %1064 = vmatpush.bf16.msrb.mxu1 %v2668_v62 }
  0xf7   :  { %971 = vmatmul.bf16.vlgmr.msra.gmra.mxu2 %v2513_v41  ;;  %985 = vmatmul.bf16.vlgmr.msra.gmra.mxu3 %v2513_v41 }
  0xf8   :  { %1078 = vmatpush.bf16.msrb.mxu2 %v2670_v1  ;;  %1092 = vmatpush.bf16.msrb.mxu3 %v2672_v2 }
  0xfa   :  { %1051 = vmatpush.bf16.msrb.mxu0 %v2680_v9  ;;  %1065 = vmatpush.bf16.msrb.mxu1 %v2682_v10 }
  0xfc   :  { %1079 = vmatpush.bf16.msrb.mxu2 %v2686_v13  ;;  %1093 = vmatpush.bf16.msrb.mxu3 %v2688_v14 }
  0xfe   :  { %1052 = vmatpush.bf16.msrb.mxu0 %v2692_v21  ;;  %1066 = vmatpush.bf16.msrb.mxu1 %v2694_v22 }
 0x100   :  { %1080 = vmatpush.bf16.msrb.mxu2 %v2698_v25  ;;  %1094 = vmatpush.bf16.msrb.mxu3 %v2700_v26 }
 0x101   :  { %v2800_v49 = vpop.f32.mrf.mxu0  ;;  %v2802_v52 = vpop.f32.mrf.mxu1 }
 0x102   :  { %1053 = vmatpush.bf16.msrb.mxu0 %v2704_v33  ;;  %1067 = vmatpush.bf16.msrb.mxu1 %v2706_v34 }
 0x104   :  { %1081 = vmatpush.bf16.msrb.mxu2 %v2710_v37  ;;  %1095 = vmatpush.bf16.msrb.mxu3 %v2712_v38 }
 0x106   :  { %1054 = vmatpush.bf16.msrb.mxu0 %v2716_v46  ;;  %1068 = vmatpush.bf16.msrb.mxu1 %v2718_v47 }
 0x108   :  { %1082 = vmatpush.bf16.msrb.mxu2 %v2722_v50  ;;  %1096 = vmatpush.bf16.msrb.mxu3 %v2724_v51  ;;  %v2810_v53 = vpop.f32.mrf.mxu2  ;;  %v2812_v54 = vpop.f32.mrf.mxu3 }
 0x109   :  { %3336 = vst [vmem:[#allocation11_spill] sm:$0xff] %v2810_v53  ;;  %v2816_v55 = vpop.f32.mrf.mxu0  ;;  %v2818_v56 = vpop.f32.mrf.mxu1 }
 0x10a   :  { %3337 = vst [vmem:[#allocation12_spill] sm:$0xff] %v2812_v54  ;;  %1055 = vmatpush.bf16.msrb.mxu0 %v2732_v58  ;;  %1069 = vmatpush.bf16.msrb.mxu1 %v2734_v59 }
 0x10b   :  { %3338 = vst [vmem:[#allocation13_spill] sm:$0xff] %v2818_v56 }
 0x10c   :  { %1083 = vmatpush.bf16.msrb.mxu2 %v2738_v0  ;;  %1097 = vmatpush.bf16.msrb.mxu3 %v2740_v3 }
 0x10e   :  { %1056 = vmatpush.bf16.msrb.mxu0 %v2744_v12  ;;  %1070 = vmatpush.bf16.msrb.mxu1 %v2746_v15 }
 0x110   :  { %1084 = vmatpush.bf16.msrb.mxu2 %v2750_v18  ;;  %1098 = vmatpush.bf16.msrb.mxu3 %v2752_v19  ;;  %v2826_v57 = vpop.f32.mrf.mxu2  ;;  %v2828_v60 = vpop.f32.mrf.mxu3 }
 0x111   :  { %3339 = vst [vmem:[#allocation14_spill] sm:$0xff] %v2826_v57  ;;  %v2832_v63 = vpop.f32.mrf.mxu0  ;;  %v2834_v4 = vpop.f32.mrf.mxu1 }
 0x112   :  { %3340 = vst [vmem:[#allocation15_spill] sm:$0xff] %v2828_v60  ;;  %1057 = vmatpush.bf16.msrb.mxu0 %v2756_v30  ;;  %1071 = vmatpush.bf16.msrb.mxu1 %v2758_v31 }
 0x113   :  { %3341 = vst [vmem:[#allocation16_spill] sm:$0xff] %v2832_v63 }
 0x114   :  { %3342 = vst [vmem:[#allocation17_spill] sm:$0xff] %v2834_v4  ;;  %1085 = vmatpush.bf16.msrb.mxu2 %v2766_v36  ;;  %1099 = vmatpush.bf16.msrb.mxu3 %v2768_v39 }
 0x116   :  { %1165 = vmatpush.bf16.msra.mxu0 %v2666_v61  ;;  %1179 = vmatpush.bf16.msra.mxu1 %v2668_v62 }
 0x118   :  { %1193 = vmatpush.bf16.msra.mxu2 %v2670_v1  ;;  %1207 = vmatpush.bf16.msra.mxu3 %v2672_v2  ;;  %v2844_v5 = vpop.f32.mrf.mxu2  ;;  %v2846_v6 = vpop.f32.mrf.mxu3 }
 0x119   :  { %3343 = vst [vmem:[#allocation18_spill] sm:$0xff] %v2844_v5  ;;  %v2850_v7 = vpop.f32.mrf.mxu0  ;;  %v2852_v8 = vpop.f32.mrf.mxu1 }
 0x11a   :  { %1166 = vmatpush.bf16.msra.mxu0 %v2680_v9  ;;  %1180 = vmatpush.bf16.msra.mxu1 %v2682_v10  ;;  %3344 = vst [vmem:[#allocation19_spill] sm:$0xff] %v2846_v6 }
 0x11b   :  { %3345 = vst [vmem:[#allocation20_spill] sm:$0xff] %v2850_v7 }
 0x11c   :  { %1194 = vmatpush.bf16.msra.mxu2 %v2686_v13  ;;  %1208 = vmatpush.bf16.msra.mxu3 %v2688_v14  ;;  %3346 = vst [vmem:[#allocation21_spill] sm:$0xff] %v2852_v8 }
 0x11e   :  { %1167 = vmatpush.bf16.msra.mxu0 %v2692_v21  ;;  %1181 = vmatpush.bf16.msra.mxu1 %v2694_v22 }
 0x120   :  { %1195 = vmatpush.bf16.msra.mxu2 %v2698_v25  ;;  %1209 = vmatpush.bf16.msra.mxu3 %v2700_v26  ;;  %v2860_v11 = vpop.f32.mrf.mxu2  ;;  %v2862_v16 = vpop.f32.mrf.mxu3 }
 0x121   :  { %3347 = vst [vmem:[#allocation22_spill] sm:$0xff] %v2860_v11  ;;  %v2866_v17 = vpop.f32.mrf.mxu0  ;;  %v2868_v20 = vpop.f32.mrf.mxu1 }
 0x122   :  { %1168 = vmatpush.bf16.msra.mxu0 %v2704_v33  ;;  %1182 = vmatpush.bf16.msra.mxu1 %v2706_v34  ;;  %3348 = vst [vmem:[#allocation23_spill] sm:$0xff] %v2862_v16 }
 0x123   :  { %3349 = vst [vmem:[#allocation24_spill] sm:$0xff] %v2866_v17 }
 0x124   :  { %1196 = vmatpush.bf16.msra.mxu2 %v2710_v37  ;;  %1210 = vmatpush.bf16.msra.mxu3 %v2712_v38  ;;  %3350 = vst [vmem:[#allocation25_spill] sm:$0xff] %v2868_v20 }
 0x126   :  { %1169 = vmatpush.bf16.msra.mxu0 %v2716_v46  ;;  %1183 = vmatpush.bf16.msra.mxu1 %v2718_v47 }
 0x128   :  { %1197 = vmatpush.bf16.msra.mxu2 %v2722_v50  ;;  %1211 = vmatpush.bf16.msra.mxu3 %v2724_v51  ;;  %v2876_v23 = vpop.f32.mrf.mxu2  ;;  %v2878_v24 = vpop.f32.mrf.mxu3 }
 0x129   :  { %3351 = vst [vmem:[#allocation26_spill] sm:$0xff] %v2876_v23  ;;  %v2882_v27 = vpop.f32.mrf.mxu0  ;;  %v2884_v28 = vpop.f32.mrf.mxu1 }
 0x12a   :  { %1170 = vmatpush.bf16.msra.mxu0 %v2732_v58  ;;  %1184 = vmatpush.bf16.msra.mxu1 %v2734_v59  ;;  %3352 = vst [vmem:[#allocation27_spill] sm:$0xff] %v2878_v24 }
 0x12b   :  { %3353 = vst [vmem:[#allocation28_spill] sm:$0xff] %v2882_v27 }
 0x12c   :  { %1198 = vmatpush.bf16.msra.mxu2 %v2738_v0  ;;  %1212 = vmatpush.bf16.msra.mxu3 %v2740_v3  ;;  %3354 = vst [vmem:[#allocation29_spill] sm:$0xff] %v2884_v28 }
 0x12e   :  { %1171 = vmatpush.bf16.msra.mxu0 %v2744_v12  ;;  %1185 = vmatpush.bf16.msra.mxu1 %v2746_v15 }
 0x130   :  { %1199 = vmatpush.bf16.msra.mxu2 %v2750_v18  ;;  %1213 = vmatpush.bf16.msra.mxu3 %v2752_v19  ;;  %v2892_v29 = vpop.f32.mrf.mxu2  ;;  %v2894_v41 = vpop.f32.mrf.mxu3 }
 0x131   :  { %3355 = vst [vmem:[#allocation30_spill] sm:$0xff] %v2892_v29  ;;  %v2898_v24 = vpop.f32.mrf.mxu0  ;;  %v2900_v23 = vpop.f32.mrf.mxu1 }
 0x132   :  { %1172 = vmatpush.bf16.msra.mxu0 %v2756_v30  ;;  %1186 = vmatpush.bf16.msra.mxu1 %v2758_v31  ;;  %3356 = vst [vmem:[#allocation31_spill] sm:$0xff] %v2894_v41 }
 0x133   :  { %3357 = vst [vmem:[#allocation32_spill] sm:$0xff] %v2898_v24 }
 0x134   :  { %1200 = vmatpush.bf16.msra.mxu2 %v2766_v36  ;;  %1214 = vmatpush.bf16.msra.mxu3 %v2768_v39  ;;  %3358 = vst [vmem:[#allocation33_spill] sm:$0xff] %v2900_v23 }
 0x138   :  { %v2902_v28 = vpop.f32.mrf.mxu2  ;;  %v2904_v27 = vpop.f32.mrf.mxu3 }
 0x139   :  { %3359 = vst [vmem:[#allocation34_spill] sm:$0xff] %v2902_v28  ;;  %v2906_v20 = vpop.f32.mrf.mxu0  ;;  %v2908_v17 = vpop.f32.mrf.mxu1 }
 0x13a   :  { %3360 = vst [vmem:[#allocation35_spill] sm:$0xff] %v2904_v27 }
 0x13b   :  { %3361 = vst [vmem:[#allocation36_spill] sm:$0xff] %v2906_v20 }
 0x13c   :  { %3362 = vst [vmem:[#allocation37_spill] sm:$0xff] %v2908_v17 }
 0x140   :  { %v2910_v11 = vpop.f32.mrf.mxu2  ;;  %v2912_v29 = vpop.f32.mrf.mxu3 }
 0x141   :  { %3363 = vst [vmem:[#allocation38_spill] sm:$0xff] %v2910_v11  ;;  %v2914_v41 = vpop.f32.mrf.mxu0  ;;  %v2916_v16 = vpop.f32.mrf.mxu1 }
 0x142   :  { %3364 = vst [vmem:[#allocation39_spill] sm:$0xff] %v2912_v29 }
 0x143   :  { %3365 = vst [vmem:[#allocation40_spill] sm:$0xff] %v2914_v41 }
 0x144   :  { %3366 = vst [vmem:[#allocation41_spill] sm:$0xff] %v2916_v16 }
 0x148   :  { %v2918_v6 = vpop.f32.mrf.mxu2  ;;  %v2920_v24 = vpop.f32.mrf.mxu3 }
 0x149   :  { %3367 = vst [vmem:[#allocation42_spill] sm:$0xff] %v2918_v6  ;;  %v2922_v23 = vpop.f32.mrf.mxu0  ;;  %v2924_v28 = vpop.f32.mrf.mxu1 }
 0x14a   :  { %3368 = vst [vmem:[#allocation43_spill] sm:$0xff] %v2920_v24 }
 0x14b   :  { %3369 = vst [vmem:[#allocation44_spill] sm:$0xff] %v2922_v23 }
 0x14c   :  { %3370 = vst [vmem:[#allocation45_spill] sm:$0xff] %v2924_v28 }
 0x150   :  { %v2926_v27 = vpop.f32.mrf.mxu2  ;;  %v2928_v20 = vpop.f32.mrf.mxu3 }
 0x151   :  { %3371 = vst [vmem:[#allocation46_spill] sm:$0xff] %v2926_v27  ;;  %v2930_v17 = vpop.f32.mrf.mxu0  ;;  %v2932_v11 = vpop.f32.mrf.mxu1 }
 0x152   :  { %3372 = vst [vmem:[#allocation47_spill] sm:$0xff] %v2928_v20 }
 0x153   :  { %3373 = vst [vmem:[#allocation48_spill] sm:$0xff] %v2930_v17 }
 0x154   :  { %3374 = vst [vmem:[#allocation49_spill] sm:$0xff] %v2932_v11 }
 0x158   :  { %v2934_v29 = vpop.f32.mrf.mxu2  ;;  %v2936_v41 = vpop.f32.mrf.mxu3 }
 0x159   :  { %3375 = vst [vmem:[#allocation50_spill] sm:$0xff] %v2934_v29  ;;  %v2938_v16 = vpop.f32.mrf.mxu0  ;;  %v2940_v6 = vpop.f32.mrf.mxu1 }
 0x15a   :  { %3376 = vst [vmem:[#allocation51_spill] sm:$0xff] %v2936_v41 }
 0x15b   :  { %3377 = vst [vmem:[#allocation52_spill] sm:$0xff] %v2938_v16 }
 0x15c   :  { %3378 = vst [vmem:[#allocation53_spill] sm:$0xff] %v2940_v6  ;;  %v80_v6 = vld [vmem:[%s3332_s3] sm:$0xf] }
 0x15d   :  { %v2961_v16 = vperm.slane %v80_v6, 0  ;;  %v2973_v7 = vperm.slane %v80_v6, 3  ;;  %v2975_v4 = vperm.slane %v80_v6, 2 }
 0x160   :  { %v2942_v24 = vpop.f32.mrf.mxu2  ;;  %v2944_v23 = vpop.f32.mrf.mxu3 }
 0x161   :  { %3379 = vst [vmem:[#allocation54_spill] sm:$0xff] %v2942_v24  ;;  %v2946_v28 = vpop.f32.mrf.mxu0  ;;  %v2948_v27 = vpop.f32.mrf.mxu1  ;;  %v2963_v24 = vperm.slane %v80_v6, 1 }
 0x162   :  { %3380 = vst [vmem:[#allocation55_spill] sm:$0xff] %v2944_v23 }
 0x163   :  { %3381 = vst [vmem:[#allocation56_spill] sm:$0xff] %v2946_v28 }
 0x164   :  { %3382 = vst [vmem:[#allocation57_spill] sm:$0xff] %v2948_v27 }
 0x168   :  { %v2950_v20 = vpop.f32.mrf.mxu2  ;;  %v2952_v17 = vpop.f32.mrf.mxu3 }
 0x169   :  { %3383 = vst [vmem:[#allocation58_spill] sm:$0xff] %v2950_v20  ;;  %v2954_v11 = vpop.f32.mrf.mxu0  ;;  %v2956_v29 = vpop.f32.mrf.mxu1  ;;  %v151_v20 = vadd.f32 %v2760_v32, %v2961_v16  ;;  %v167_v32 = vadd.f32 %v2786_v44, %v2963_v24  ;;  %v195_v44 = vadd.f32 %v2796_v48, %v2973_v7 }
 0x16a   :  { %3384 = vst [vmem:[#allocation59_spill] sm:$0xff] %v2952_v17 }
 0x16b   :  { %3385 = vst [vmem:[#allocation60_spill] sm:$0xff] %v2954_v11  ;;  %v165_v11 = vadd.f32 %v2762_v35, %v2963_v24 }
 0x16c   :  { %3386 = vst [vmem:[#allocation61_spill] sm:$0xff] %v2956_v29 }
 0x170   :  { %v2965_v23 = vpop.f32.mrf.mxu2  ;;  %v2967_v28 = vpop.f32.mrf.mxu3 }
 0x171   :  { %3387 = vst [vmem:[#allocation62_spill] sm:$0xff] %v2965_v23 }
 0x172   :  { %3388 = vst [vmem:[#allocation63_spill] sm:$0xff] %v2967_v28  ;;  %v944_v17 = vpop.f32.mrf.mxu0  ;;  %v958_v29 = vpop.f32.mrf.mxu1  ;;  %v153_v28 = vadd.f32 %v2784_v43, %v2961_v16 }
 0x173   :  { %v991_v27 = vadd.f32 %v944_v17, %v151_v20  ;;  %v992_v41 = vadd.f32 %v958_v29, %v165_v11  ;;  %v193_v11 = vadd.f32 %v2778_v42, %v2973_v7  ;;  %v179_v17 = vadd.f32 %v2774_v40, %v2975_v4 }
 0x175   :  { %v999_v5 = vsub.f32 0.0, %v991_v27  ;;  %v1000_v8 = vsub.f32 0.0, %v992_v41 }
 0x177   :  { %v1003_v63 = vmul.f32 1.442695, %v999_v5  ;;  %v1005_v23 = vmul.f32 1.442695, %v1000_v8 }
 0x179   :  { %2163 = vpow2.f32 %v1003_v63 }
 0x17a   :  { %v972_v35 = vpop.f32.mrf.mxu2  ;;  %v986_v57 = vpop.f32.mrf.mxu3  ;;  %2165 = vpow2.f32 %v1005_v23 }
 0x17b   :  { %v946_v6 = vpop.f32.mrf.mxu0  ;;  %v960_v20 = vpop.f32.mrf.mxu1  ;;  %v993_v27 = vadd.f32 %v972_v35, %v179_v17  ;;  %v994_v29 = vadd.f32 %v986_v57, %v193_v11  ;;  %v181_v11 = vadd.f32 %v2792_v45, %v2975_v4 }
 0x17c   :  { %v995_v5 = vadd.f32 %v946_v6, %v153_v28  ;;  %v996_v8 = vadd.f32 %v960_v20, %v167_v32 }
 0x17d   :  { %2167 = vtanh.f32 %v993_v27  ;;  %v1021_v42 = vsub.f32 0.0, %v994_v29 }
 0x17e   :  { %v1001_v43 = vsub.f32 0.0, %v995_v5  ;;  %v1002_v41 = vsub.f32 0.0, %v996_v8 }
 0x17f   :  { %v2164_v60 = vpop.eup %2163  ;;  %v1023_v32 = vmul.f32 1.442695, %v1021_v42 }
 0x180   :  { %v1007_v63 = vmul.f32 1.442695, %v1001_v43  ;;  %v2166_v54 = vpop.eup %2165  ;;  %v1011_v53 = vadd.f32 1.0, %v2164_v60  ;;  %v1009_v56 = vmul.f32 1.442695, %v1002_v41 }
 0x181   :  { %v1012_v40 = vadd.f32 1.0, %v2166_v54 }
 0x182   :  { %2169 = vpow2.f32 %v1007_v63  ;;  %v988_v23 = vpop.f32.mrf.mxu3  ;;  %v974_v57 = vpop.f32.mrf.mxu2 }
 0x183   :  { %2171 = vrcp.f32 %v1011_v53  ;;  %v998_v28 = vadd.f32 %v988_v23, %v195_v44  ;;  %v2168_v48 = vpop.eup %2167  ;;  %v997_v60 = vadd.f32 %v974_v57, %v181_v11 }
 0x184   :  { %2173 = vrcp.f32 %v1012_v40 }
 0x185   :  { %2175 = vpow2.f32 %v1009_v56  ;;  %v1022_v35 = vsub.f32 0.0, %v998_v28 }
 0x186   :  { %2177 = vpow2.f32 %v1023_v32 }
 0x187   :  { %v1025_v17 = vmul.f32 1.442695, %v1022_v35 }
 0x188   :  { %v2170_v6 = vpop.eup %2169 }
 0x189   :  { %v2172_v20 = vpop.eup %2171  ;;  %v1013_v5 = vadd.f32 1.0, %v2170_v6  ;;  %2179 = vpow2.f32 %v1025_v17 }
 0x18a   :  { %v2174_v54 = vpop.eup %2173  ;;  %v1033_v8 = vmul.f32 %v2172_v20, %v2168_v48  ;;  %v227_v20 = vadd.f32 %v2800_v49, %v2961_v16 }
 0x18b   :  { %v2176_v53 = vpop.eup %2175  ;;  %v1031_v27 = vmul.f32 0.0, %v2174_v54  ;;  %2181 = vrcp.f32 %v1013_v5  ;;  %v241_v5 = vadd.f32 %v2802_v52, %v2963_v24 }
 0x18c   :  { %v1014_v29 = vadd.f32 1.0, %v2176_v53  ;;  %2183 = vtanh.f32 %v997_v60  ;;  %v2178_v43 = vpop.eup %2177 }
 0x18d   :  { %v2989_v56 = vadd.f32 %v1033_v8, %v1031_v27  ;;  %v1027_v63 = vadd.f32 1.0, %v2178_v43 }
 0x18e   :  { %2185 = vrcp.f32 %v1014_v29 }
 0x18f   :  { %v2180_v45 = vpop.eup %2179  ;;  %2187 = vrcp.f32 %v1027_v63  ;;  %v3389_v63 = vld [vmem:[#allocation13_spill] sm:$0xff] }
 0x190   :  { %v1028_v23 = vadd.f32 1.0, %v2180_v45  ;;  %2189 = vtanh.f32 %v2989_v56 }
 0x191   :  { %v2182_v41 = vpop.eup %2181 }
 0x192   :  { %v2184_v44 = vpop.eup %2183  ;;  %2191 = vrcp.f32 %v1028_v23  ;;  %v3390_v23 = vld [vmem:[#allocation11_spill] sm:$0xff] }
 0x193   :  { %v1034_v42 = vmul.f32 %v2184_v44, %v2182_v41  ;;  %v229_v44 = vadd.f32 %v2816_v55, %v2961_v16  ;;  %v255_v52 = vadd.f32 %v3390_v23, %v2975_v4  ;;  %v3393_v23 = vld [vmem:[#allocation14_spill] sm:$0xff] }
 0x194   :  { %v2186_v40 = vpop.eup %2185 }
 0x195   :  { %v1032_v28 = vmul.f32 0.0, %v2186_v40  ;;  %v2188_v57 = vpop.eup %2187 }
 0x196   :  { %v2190_v35 = vpop.eup %2189 }
 0x197   :  { %v2992_v32 = vadd.f32 %v1034_v42, %v1032_v28  ;;  %v1039_v17 = vmul.f32 %v2190_v35, %v2188_v57  ;;  %v243_v42 = vadd.f32 %v3389_v63, %v2963_v24  ;;  %v3391_v28 = vld [vmem:[#allocation12_spill] sm:$0xff] }
 0x198   :  { %v2192_v11 = vpop.eup %2191  ;;  %v269_v57 = vadd.f32 %v3391_v28, %v2973_v7 }
 0x199   :  { %2193 = vtanh.f32 %v2992_v32 }
 0x19f   :  { %v2194_v48 = vpop.eup %2193 }
 0x1a0   :  { %v1040_v6 = vmul.f32 %v2194_v48, %v2192_v11 }
 0x1a2   :  { %v1049_v60 = vpack.c.bf16 %v1040_v6, %v1039_v17 }
 0x1a4   :  { %1058 = vmatmul.bf16.vlgmr.msrb.gmra.mxu0 %v1049_v60  ;;  %1072 = vmatmul.bf16.vlgmr.msrb.gmra.mxu1 %v1049_v60 }
 0x1a5   :  { %1086 = vmatmul.bf16.vlgmr.msrb.gmra.mxu2 %v1049_v60  ;;  %1100 = vmatmul.bf16.vlgmr.msrb.gmra.mxu3 %v1049_v60 }
 0x1a6   :  { %1280 = vmatpush.bf16.msrb.mxu0 %v2666_v61  ;;  %1294 = vmatpush.bf16.msrb.mxu1 %v2668_v62 }
 0x1a7   :  { %1308 = vmatpush.bf16.msrb.mxu2 %v2670_v1  ;;  %1322 = vmatpush.bf16.msrb.mxu3 %v2672_v2 }
 0x1aa   :  { %1281 = vmatpush.bf16.msrb.mxu0 %v2680_v9  ;;  %1295 = vmatpush.bf16.msrb.mxu1 %v2682_v10 }
 0x1ab   :  { %1309 = vmatpush.bf16.msrb.mxu2 %v2686_v13  ;;  %1323 = vmatpush.bf16.msrb.mxu3 %v2688_v14 }
 0x1ae   :  { %1282 = vmatpush.bf16.msrb.mxu0 %v2692_v21  ;;  %1296 = vmatpush.bf16.msrb.mxu1 %v2694_v22 }
 0x1af   :  { %1310 = vmatpush.bf16.msrb.mxu2 %v2698_v25  ;;  %1324 = vmatpush.bf16.msrb.mxu3 %v2700_v26 }
 0x1b2   :  { %1283 = vmatpush.bf16.msrb.mxu0 %v2704_v33  ;;  %1297 = vmatpush.bf16.msrb.mxu1 %v2706_v34 }
 0x1b3   :  { %1311 = vmatpush.bf16.msrb.mxu2 %v2710_v37  ;;  %1325 = vmatpush.bf16.msrb.mxu3 %v2712_v38 }
 0x1b6   :  { %1284 = vmatpush.bf16.msrb.mxu0 %v2716_v46  ;;  %1298 = vmatpush.bf16.msrb.mxu1 %v2718_v47 }
 0x1b7   :  { %1312 = vmatpush.bf16.msrb.mxu2 %v2722_v50  ;;  %1326 = vmatpush.bf16.msrb.mxu3 %v2724_v51 }
 0x1ba   :  { %1285 = vmatpush.bf16.msrb.mxu0 %v2732_v58  ;;  %1299 = vmatpush.bf16.msrb.mxu1 %v2734_v59 }
 0x1bb   :  { %1313 = vmatpush.bf16.msrb.mxu2 %v2738_v0  ;;  %1327 = vmatpush.bf16.msrb.mxu3 %v2740_v3 }
 0x1be   :  { %1286 = vmatpush.bf16.msrb.mxu0 %v2744_v12  ;;  %1300 = vmatpush.bf16.msrb.mxu1 %v2746_v15 }
 0x1bf   :  { %1314 = vmatpush.bf16.msrb.mxu2 %v2750_v18  ;;  %1328 = vmatpush.bf16.msrb.mxu3 %v2752_v19 }
 0x1c2   :  { %1287 = vmatpush.bf16.msrb.mxu0 %v2756_v30  ;;  %1301 = vmatpush.bf16.msrb.mxu1 %v2758_v31 }
 0x1c3   :  { %1315 = vmatpush.bf16.msrb.mxu2 %v2766_v36  ;;  %1329 = vmatpush.bf16.msrb.mxu3 %v2768_v39 }
 0x221   :  { %v1059_v54 = vpop.f32.mrf.mxu0  ;;  %v1073_v8 = vpop.f32.mrf.mxu1 }
 0x222   :  { %v1106_v53 = vadd.f32 %v1059_v54, %v227_v20  ;;  %v1107_v27 = vadd.f32 %v1073_v8, %v241_v5  ;;  %v3392_v54 = vld [vmem:[#allocation15_spill] sm:$0xff] }
 0x223   :  { %v271_v8 = vadd.f32 %v3392_v54, %v2973_v7 }
 0x224   :  { %v1114_v29 = vsub.f32 0.0, %v1106_v53  ;;  %v1115_v43 = vsub.f32 0.0, %v1107_v27 }
 0x226   :  { %v1118_v45 = vmul.f32 1.442695, %v1114_v29  ;;  %v1120_v41 = vmul.f32 1.442695, %v1115_v43 }
 0x228   :  { %2195 = vpow2.f32 %v1118_v45  ;;  %v1087_v40 = vpop.f32.mrf.mxu2  ;;  %v1101_v49 = vpop.f32.mrf.mxu3 }
 0x229   :  { %2197 = vpow2.f32 %v1120_v41  ;;  %v1061_v35 = vpop.f32.mrf.mxu0  ;;  %v1075_v11 = vpop.f32.mrf.mxu1  ;;  %v1108_v6 = vadd.f32 %v1087_v40, %v255_v52  ;;  %v1109_v60 = vadd.f32 %v1101_v49, %v269_v57  ;;  %v257_v52 = vadd.f32 %v3393_v23, %v2975_v4 }
 0x22a   :  { %v1110_v48 = vadd.f32 %v1061_v35, %v229_v44  ;;  %v1111_v17 = vadd.f32 %v1075_v11, %v243_v42 }
 0x22b   :  { %2199 = vtanh.f32 %v1108_v6  ;;  %v1136_v43 = vsub.f32 0.0, %v1109_v60 }
 0x22c   :  { %v1116_v55 = vsub.f32 0.0, %v1110_v48  ;;  %v1117_v20 = vsub.f32 0.0, %v1111_v17 }
 0x22d   :  { %v1138_v42 = vmul.f32 1.442695, %v1136_v43 }
 0x22e   :  { %v2196_v5 = vpop.eup %2195  ;;  %v1122_v53 = vmul.f32 1.442695, %v1116_v55  ;;  %v1124_v45 = vmul.f32 1.442695, %v1117_v20 }
 0x22f   :  { %v2198_v27 = vpop.eup %2197  ;;  %v1126_v29 = vadd.f32 1.0, %v2196_v5 }
 0x230   :  { %v1127_v63 = vadd.f32 1.0, %v2198_v27  ;;  %2201 = vpow2.f32 %v1122_v53  ;;  %v1103_v41 = vpop.f32.mrf.mxu3  ;;  %v1089_v40 = vpop.f32.mrf.mxu2 }
 0x231   :  { %2203 = vrcp.f32 %v1126_v29  ;;  %v1113_v44 = vadd.f32 %v1103_v41, %v271_v8  ;;  %v2200_v28 = vpop.eup %2199  ;;  %v1112_v11 = vadd.f32 %v1089_v40, %v257_v52 }
 0x232   :  { %2205 = vrcp.f32 %v1127_v63 }
 0x233   :  { %2207 = vpow2.f32 %v1124_v45  ;;  %v1137_v49 = vsub.f32 0.0, %v1113_v44 }
 0x234   :  { %2209 = vpow2.f32 %v1138_v42 }
 0x235   :  { %v1140_v57 = vmul.f32 1.442695, %v1137_v49 }
 0x236   :  { %v2202_v35 = vpop.eup %2201 }
 0x237   :  { %v2204_v48 = vpop.eup %2203  ;;  %v1128_v17 = vadd.f32 1.0, %v2202_v35  ;;  %2211 = vpow2.f32 %v1140_v57 }
 0x238   :  { %v2206_v6 = vpop.eup %2205  ;;  %v1148_v60 = vmul.f32 %v2204_v48, %v2200_v28 }
 0x239   :  { %v2208_v55 = vpop.eup %2207  ;;  %v1146_v20 = vmul.f32 %v2206_v6, %v2989_v56  ;;  %2213 = vrcp.f32 %v1128_v17 }
 0x23a   :  { %v1129_v5 = vadd.f32 1.0, %v2208_v55  ;;  %2215 = vtanh.f32 %v1112_v11  ;;  %v2210_v8 = vpop.eup %2209  ;;  %v3395_v11 = vld [vmem:[#allocation17_spill] sm:$0xff] }
 0x23b   :  { %v3044_v54 = vadd.f32 %v1148_v60, %v1146_v20  ;;  %v1142_v43 = vadd.f32 1.0, %v2210_v8  ;;  %v317_v48 = vadd.f32 %v3395_v11, %v2963_v24 }
 0x23c   :  { %2217 = vrcp.f32 %v1129_v5 }
 0x23d   :  { %v2212_v53 = vpop.eup %2211  ;;  %2219 = vrcp.f32 %v1142_v43  ;;  %v3397_v43 = vld [vmem:[#allocation21_spill] sm:$0xff] }
 0x23e   :  { %v1143_v41 = vadd.f32 1.0, %v2212_v53  ;;  %2221 = vtanh.f32 %v3044_v54 }
 0x23f   :  { %v2214_v27 = vpop.eup %2213 }
 0x240   :  { %v2216_v29 = vpop.eup %2215  ;;  %2223 = vrcp.f32 %v1143_v41 }
 0x241   :  { %v1149_v45 = vmul.f32 %v2216_v29, %v2214_v27  ;;  %v3396_v27 = vld [vmem:[#allocation20_spill] sm:$0xff] }
 0x242   :  { %v2218_v63 = vpop.eup %2217  ;;  %v305_v29 = vadd.f32 %v3396_v27, %v2961_v16 }
 0x243   :  { %v1147_v44 = vmul.f32 %v2218_v63, %v2992_v32  ;;  %v2220_v42 = vpop.eup %2219  ;;  %v3394_v32 = vld [vmem:[#allocation16_spill] sm:$0xff] }
 0x244   :  { %v2222_v40 = vpop.eup %2221  ;;  %v303_v35 = vadd.f32 %v3394_v32, %v2961_v16 }
 0x245   :  { %v3048_v56 = vadd.f32 %v1149_v45, %v1147_v44  ;;  %v1154_v52 = vmul.f32 %v2222_v40, %v2220_v42  ;;  %v319_v45 = vadd.f32 %v3397_v43, %v2963_v24  ;;  %v3398_v44 = vld [vmem:[#allocation18_spill] sm:$0xff]  ;;  %v3399_v40 = vld [vmem:[#allocation19_spill] sm:$0xff] }
 0x246   :  { %v2224_v49 = vpop.eup %2223  ;;  %v331_v42 = vadd.f32 %v3398_v44, %v2975_v4  ;;  %v3401_v44 = vld [vmem:[#allocation22_spill] sm:$0xff] }
 0x247   :  { %2225 = vtanh.f32 %v3048_v56 }
 0x24d   :  { %v2226_v23 = vpop.eup %2225 }
 0x24e   :  { %v1155_v28 = vmul.f32 %v2226_v23, %v2224_v49  ;;  %v345_v49 = vadd.f32 %v3399_v40, %v2973_v7 }
 0x250   :  { %v1164_v57 = vpack.c.bf16 %v1155_v28, %v1154_v52 }
 0x252   :  { %1173 = vmatmul.bf16.vlgmr.msra.gmra.mxu0 %v1164_v57  ;;  %1187 = vmatmul.bf16.vlgmr.msra.gmra.mxu1 %v1164_v57 }
 0x253   :  { %1201 = vmatmul.bf16.vlgmr.msra.gmra.mxu2 %v1164_v57  ;;  %1215 = vmatmul.bf16.vlgmr.msra.gmra.mxu3 %v1164_v57 }
 0x254   :  { %1395 = vmatpush.bf16.msra.mxu0 %v2666_v61  ;;  %1409 = vmatpush.bf16.msra.mxu1 %v2668_v62 }
 0x255   :  { %1423 = vmatpush.bf16.msra.mxu2 %v2670_v1  ;;  %1437 = vmatpush.bf16.msra.mxu3 %v2672_v2 }
 0x258   :  { %1396 = vmatpush.bf16.msra.mxu0 %v2680_v9  ;;  %1410 = vmatpush.bf16.msra.mxu1 %v2682_v10 }
 0x259   :  { %1424 = vmatpush.bf16.msra.mxu2 %v2686_v13  ;;  %1438 = vmatpush.bf16.msra.mxu3 %v2688_v14 }
 0x25c   :  { %1397 = vmatpush.bf16.msra.mxu0 %v2692_v21  ;;  %1411 = vmatpush.bf16.msra.mxu1 %v2694_v22 }
 0x25d   :  { %1425 = vmatpush.bf16.msra.mxu2 %v2698_v25  ;;  %1439 = vmatpush.bf16.msra.mxu3 %v2700_v26 }
 0x260   :  { %1398 = vmatpush.bf16.msra.mxu0 %v2704_v33  ;;  %1412 = vmatpush.bf16.msra.mxu1 %v2706_v34 }
 0x261   :  { %1426 = vmatpush.bf16.msra.mxu2 %v2710_v37  ;;  %1440 = vmatpush.bf16.msra.mxu3 %v2712_v38 }
 0x264   :  { %1399 = vmatpush.bf16.msra.mxu0 %v2716_v46  ;;  %1413 = vmatpush.bf16.msra.mxu1 %v2718_v47 }
 0x265   :  { %1427 = vmatpush.bf16.msra.mxu2 %v2722_v50  ;;  %1441 = vmatpush.bf16.msra.mxu3 %v2724_v51 }
 0x268   :  { %1400 = vmatpush.bf16.msra.mxu0 %v2732_v58  ;;  %1414 = vmatpush.bf16.msra.mxu1 %v2734_v59 }
 0x269   :  { %1428 = vmatpush.bf16.msra.mxu2 %v2738_v0  ;;  %1442 = vmatpush.bf16.msra.mxu3 %v2740_v3 }
 0x26c   :  { %1401 = vmatpush.bf16.msra.mxu0 %v2744_v12  ;;  %1415 = vmatpush.bf16.msra.mxu1 %v2746_v15 }
 0x26d   :  { %1429 = vmatpush.bf16.msra.mxu2 %v2750_v18  ;;  %1443 = vmatpush.bf16.msra.mxu3 %v2752_v19 }
 0x270   :  { %1402 = vmatpush.bf16.msra.mxu0 %v2756_v30  ;;  %1416 = vmatpush.bf16.msra.mxu1 %v2758_v31 }
 0x271   :  { %1430 = vmatpush.bf16.msra.mxu2 %v2766_v36  ;;  %1444 = vmatpush.bf16.msra.mxu3 %v2768_v39 }
 0x2cf   :  { %v1174_v17 = vpop.f32.mrf.mxu0  ;;  %v1188_v6 = vpop.f32.mrf.mxu1 }
 0x2d0   :  { %v1221_v60 = vadd.f32 %v1174_v17, %v303_v35  ;;  %v1222_v55 = vadd.f32 %v1188_v6, %v317_v48  ;;  %v3400_v6 = vld [vmem:[#allocation23_spill] sm:$0xff] }
 0x2d2   :  { %v1229_v20 = vsub.f32 0.0, %v1221_v60  ;;  %v1230_v5 = vsub.f32 0.0, %v1222_v55  ;;  %v347_v60 = vadd.f32 %v3400_v6, %v2973_v7 }
 0x2d4   :  { %v1233_v8 = vmul.f32 1.442695, %v1229_v20  ;;  %v1235_v53 = vmul.f32 1.442695, %v1230_v5 }
 0x2d6   :  { %2227 = vpow2.f32 %v1233_v8  ;;  %v1202_v63 = vpop.f32.mrf.mxu2  ;;  %v1216_v41 = vpop.f32.mrf.mxu3 }
 0x2d7   :  { %2229 = vpow2.f32 %v1235_v53  ;;  %v1176_v23 = vpop.f32.mrf.mxu0  ;;  %v1190_v52 = vpop.f32.mrf.mxu1  ;;  %v1223_v32 = vadd.f32 %v1202_v63, %v331_v42  ;;  %v1224_v35 = vadd.f32 %v1216_v41, %v345_v49  ;;  %v333_v42 = vadd.f32 %v3401_v44, %v2975_v4 }
 0x2d8   :  { %v1225_v28 = vadd.f32 %v1176_v23, %v305_v29  ;;  %v1226_v57 = vadd.f32 %v1190_v52, %v319_v45 }
 0x2d9   :  { %2231 = vtanh.f32 %v1223_v32  ;;  %v1251_v8 = vsub.f32 0.0, %v1224_v35 }
 0x2da   :  { %v1231_v11 = vsub.f32 0.0, %v1225_v28  ;;  %v1232_v48 = vsub.f32 0.0, %v1226_v57 }
 0x2db   :  { %v1253_v45 = vmul.f32 1.442695, %v1251_v8 }
 0x2dc   :  { %v2228_v17 = vpop.eup %2227  ;;  %v1237_v55 = vmul.f32 1.442695, %v1231_v11  ;;  %v1239_v27 = vmul.f32 1.442695, %v1232_v48 }
 0x2dd   :  { %v2230_v20 = vpop.eup %2229  ;;  %v1241_v5 = vadd.f32 1.0, %v2228_v17 }
 0x2de   :  { %v1242_v43 = vadd.f32 1.0, %v2230_v20  ;;  %2233 = vpow2.f32 %v1237_v55  ;;  %v1218_v53 = vpop.f32.mrf.mxu3  ;;  %v1204_v63 = vpop.f32.mrf.mxu2 }
 0x2df   :  { %2235 = vrcp.f32 %v1241_v5  ;;  %v1228_v29 = vadd.f32 %v1218_v53, %v347_v60  ;;  %v2232_v40 = vpop.eup %2231  ;;  %v1227_v52 = vadd.f32 %v1204_v63, %v333_v42 }
 0x2e0   :  { %2237 = vrcp.f32 %v1242_v43 }
 0x2e1   :  { %2239 = vpow2.f32 %v1239_v27  ;;  %v1252_v41 = vsub.f32 0.0, %v1228_v29 }
 0x2e2   :  { %2241 = vpow2.f32 %v1253_v45 }
 0x2e3   :  { %v1255_v49 = vmul.f32 1.442695, %v1252_v41 }
 0x2e4   :  { %v2234_v23 = vpop.eup %2233 }
 0x2e5   :  { %v2236_v28 = vpop.eup %2235  ;;  %v1243_v57 = vadd.f32 1.0, %v2234_v23  ;;  %2243 = vpow2.f32 %v1255_v49 }
 0x2e6   :  { %v2238_v32 = vpop.eup %2237  ;;  %v1263_v35 = vmul.f32 %v2236_v28, %v2232_v40 }
 0x2e7   :  { %v2240_v11 = vpop.eup %2239  ;;  %v1261_v48 = vmul.f32 %v2238_v32, %v3044_v54  ;;  %2245 = vrcp.f32 %v1243_v57 }
 0x2e8   :  { %v1244_v17 = vadd.f32 1.0, %v2240_v11  ;;  %2247 = vtanh.f32 %v1227_v52  ;;  %v2242_v60 = vpop.eup %2241  ;;  %v3403_v52 = vld [vmem:[#allocation25_spill] sm:$0xff] }
 0x2e9   :  { %v3100_v6 = vadd.f32 %v1263_v35, %v1261_v48  ;;  %v1257_v8 = vadd.f32 1.0, %v2242_v60  ;;  %v393_v28 = vadd.f32 %v3403_v52, %v2963_v24 }
 0x2ea   :  { %2249 = vrcp.f32 %v1244_v17 }
 0x2eb   :  { %v2244_v55 = vpop.eup %2243  ;;  %2251 = vrcp.f32 %v1257_v8  ;;  %v3405_v8 = vld [vmem:[#allocation29_spill] sm:$0xff] }
 0x2ec   :  { %v1258_v53 = vadd.f32 1.0, %v2244_v55  ;;  %2253 = vtanh.f32 %v3100_v6 }
 0x2ed   :  { %v2246_v20 = vpop.eup %2245 }
 0x2ee   :  { %v2248_v5 = vpop.eup %2247  ;;  %2255 = vrcp.f32 %v1258_v53 }
 0x2ef   :  { %v1264_v27 = vmul.f32 %v2248_v5, %v2246_v20  ;;  %v3404_v20 = vld [vmem:[#allocation28_spill] sm:$0xff] }
 0x2f0   :  { %v2250_v43 = vpop.eup %2249  ;;  %v381_v5 = vadd.f32 %v3404_v20, %v2961_v16 }
 0x2f1   :  { %v1262_v29 = vmul.f32 %v2250_v43, %v3048_v56  ;;  %v2252_v45 = vpop.eup %2251  ;;  %v3402_v56 = vld [vmem:[#allocation24_spill] sm:$0xff] }
 0x2f2   :  { %v2254_v63 = vpop.eup %2253  ;;  %v379_v23 = vadd.f32 %v3402_v56, %v2961_v16 }
 0x2f3   :  { %v3104_v54 = vadd.f32 %v1264_v27, %v1262_v29  ;;  %v1269_v42 = vmul.f32 %v2254_v63, %v2252_v45  ;;  %v395_v27 = vadd.f32 %v3405_v8, %v2963_v24  ;;  %v3406_v29 = vld [vmem:[#allocation26_spill] sm:$0xff]  ;;  %v3407_v63 = vld [vmem:[#allocation27_spill] sm:$0xff] }
 0x2f4   :  { %v2256_v41 = vpop.eup %2255  ;;  %v407_v45 = vadd.f32 %v3406_v29, %v2975_v4  ;;  %v3409_v29 = vld [vmem:[#allocation30_spill] sm:$0xff] }
 0x2f5   :  { %2257 = vtanh.f32 %v3104_v54 }
 0x2fb   :  { %v2258_v44 = vpop.eup %2257 }
 0x2fc   :  { %v1270_v40 = vmul.f32 %v2258_v44, %v2256_v41  ;;  %v421_v41 = vadd.f32 %v3407_v63, %v2973_v7 }
 0x2fe   :  { %v1279_v49 = vpack.c.bf16 %v1270_v40, %v1269_v42 }
 0x300   :  { %1288 = vmatmul.bf16.vlgmr.msrb.gmra.mxu0 %v1279_v49  ;;  %1302 = vmatmul.bf16.vlgmr.msrb.gmra.mxu1 %v1279_v49 }
 0x301   :  { %1316 = vmatmul.bf16.vlgmr.msrb.gmra.mxu2 %v1279_v49  ;;  %1330 = vmatmul.bf16.vlgmr.msrb.gmra.mxu3 %v1279_v49 }
 0x302   :  { %1510 = vmatpush.bf16.msrb.mxu0 %v2666_v61  ;;  %1524 = vmatpush.bf16.msrb.mxu1 %v2668_v62 }
 0x303   :  { %1538 = vmatpush.bf16.msrb.mxu2 %v2670_v1  ;;  %1552 = vmatpush.bf16.msrb.mxu3 %v2672_v2 }
 0x306   :  { %1511 = vmatpush.bf16.msrb.mxu0 %v2680_v9  ;;  %1525 = vmatpush.bf16.msrb.mxu1 %v2682_v10 }
 0x307   :  { %1539 = vmatpush.bf16.msrb.mxu2 %v2686_v13  ;;  %1553 = vmatpush.bf16.msrb.mxu3 %v2688_v14 }
 0x30a   :  { %1512 = vmatpush.bf16.msrb.mxu0 %v2692_v21  ;;  %1526 = vmatpush.bf16.msrb.mxu1 %v2694_v22 }
 0x30b   :  { %1540 = vmatpush.bf16.msrb.mxu2 %v2698_v25  ;;  %1554 = vmatpush.bf16.msrb.mxu3 %v2700_v26 }
 0x30e   :  { %1513 = vmatpush.bf16.msrb.mxu0 %v2704_v33  ;;  %1527 = vmatpush.bf16.msrb.mxu1 %v2706_v34 }
 0x30f   :  { %1541 = vmatpush.bf16.msrb.mxu2 %v2710_v37  ;;  %1555 = vmatpush.bf16.msrb.mxu3 %v2712_v38 }
 0x312   :  { %1514 = vmatpush.bf16.msrb.mxu0 %v2716_v46  ;;  %1528 = vmatpush.bf16.msrb.mxu1 %v2718_v47 }
 0x313   :  { %1542 = vmatpush.bf16.msrb.mxu2 %v2722_v50  ;;  %1556 = vmatpush.bf16.msrb.mxu3 %v2724_v51 }
 0x316   :  { %1515 = vmatpush.bf16.msrb.mxu0 %v2732_v58  ;;  %1529 = vmatpush.bf16.msrb.mxu1 %v2734_v59 }
 0x317   :  { %1543 = vmatpush.bf16.msrb.mxu2 %v2738_v0  ;;  %1557 = vmatpush.bf16.msrb.mxu3 %v2740_v3 }
 0x31a   :  { %1516 = vmatpush.bf16.msrb.mxu0 %v2744_v12  ;;  %1530 = vmatpush.bf16.msrb.mxu1 %v2746_v15 }
 0x31b   :  { %1544 = vmatpush.bf16.msrb.mxu2 %v2750_v18  ;;  %1558 = vmatpush.bf16.msrb.mxu3 %v2752_v19 }
 0x31e   :  { %1517 = vmatpush.bf16.msrb.mxu0 %v2756_v30  ;;  %1531 = vmatpush.bf16.msrb.mxu1 %v2758_v31 }
 0x31f   :  { %1545 = vmatpush.bf16.msrb.mxu2 %v2766_v36  ;;  %1559 = vmatpush.bf16.msrb.mxu3 %v2768_v39 }
 0x37d   :  { %v1289_v57 = vpop.f32.mrf.mxu0  ;;  %v1303_v32 = vpop.f32.mrf.mxu1 }
 0x37e   :  { %v1336_v35 = vadd.f32 %v1289_v57, %v379_v23  ;;  %v1337_v11 = vadd.f32 %v1303_v32, %v393_v28  ;;  %v3408_v32 = vld [vmem:[#allocation31_spill] sm:$0xff] }
 0x380   :  { %v1344_v48 = vsub.f32 0.0, %v1336_v35  ;;  %v1345_v17 = vsub.f32 0.0, %v1337_v11  ;;  %v423_v35 = vadd.f32 %v3408_v32, %v2973_v7 }
 0x382   :  { %v1348_v60 = vmul.f32 1.442695, %v1344_v48  ;;  %v1350_v55 = vmul.f32 1.442695, %v1345_v17 }
 0x384   :  { %2259 = vpow2.f32 %v1348_v60  ;;  %v1317_v43 = vpop.f32.mrf.mxu2  ;;  %v1331_v53 = vpop.f32.mrf.mxu3 }
 0x385   :  { %2261 = vpow2.f32 %v1350_v55  ;;  %v1291_v44 = vpop.f32.mrf.mxu0  ;;  %v1305_v42 = vpop.f32.mrf.mxu1  ;;  %v1338_v56 = vadd.f32 %v1317_v43, %v407_v45  ;;  %v1339_v23 = vadd.f32 %v1331_v53, %v421_v41  ;;  %v409_v45 = vadd.f32 %v3409_v29, %v2975_v4 }
 0x386   :  { %v1340_v40 = vadd.f32 %v1291_v44, %v381_v5  ;;  %v1341_v49 = vadd.f32 %v1305_v42, %v395_v27 }
 0x387   :  { %2263 = vtanh.f32 %v1338_v56  ;;  %v1366_v60 = vsub.f32 0.0, %v1339_v23 }
 0x388   :  { %v1346_v52 = vsub.f32 0.0, %v1340_v40  ;;  %v1347_v28 = vsub.f32 0.0, %v1341_v49 }
 0x389   :  { %v1368_v27 = vmul.f32 1.442695, %v1366_v60 }
 0x38a   :  { %v2260_v57 = vpop.eup %2259  ;;  %v1352_v11 = vmul.f32 1.442695, %v1346_v52  ;;  %v1354_v20 = vmul.f32 1.442695, %v1347_v28 }
 0x38b   :  { %v2262_v48 = vpop.eup %2261  ;;  %v1356_v17 = vadd.f32 1.0, %v2260_v57 }
 0x38c   :  { %v1357_v8 = vadd.f32 1.0, %v2262_v48  ;;  %2265 = vpow2.f32 %v1352_v11  ;;  %v1333_v55 = vpop.f32.mrf.mxu3  ;;  %v1319_v43 = vpop.f32.mrf.mxu2 }
 0x38d   :  { %2267 = vrcp.f32 %v1356_v17  ;;  %v1343_v5 = vadd.f32 %v1333_v55, %v423_v35  ;;  %v2264_v63 = vpop.eup %2263  ;;  %v1342_v42 = vadd.f32 %v1319_v43, %v409_v45 }
 0x38e   :  { %2269 = vrcp.f32 %v1357_v8 }
 0x38f   :  { %2271 = vpow2.f32 %v1354_v20  ;;  %v1367_v53 = vsub.f32 0.0, %v1343_v5 }
 0x390   :  { %2273 = vpow2.f32 %v1368_v27 }
 0x391   :  { %v1370_v41 = vmul.f32 1.442695, %v1367_v53 }
 0x392   :  { %v2266_v44 = vpop.eup %2265 }
 0x393   :  { %v2268_v40 = vpop.eup %2267  ;;  %v1358_v49 = vadd.f32 1.0, %v2266_v44  ;;  %2275 = vpow2.f32 %v1370_v41 }
 0x394   :  { %v2270_v56 = vpop.eup %2269  ;;  %v1378_v23 = vmul.f32 %v2268_v40, %v2264_v63 }
 0x395   :  { %v2272_v52 = vpop.eup %2271  ;;  %v1376_v28 = vmul.f32 %v2270_v56, %v3100_v6  ;;  %2277 = vrcp.f32 %v1358_v49 }
 0x396   :  { %v1359_v57 = vadd.f32 1.0, %v2272_v52  ;;  %2279 = vtanh.f32 %v1342_v42  ;;  %v2274_v35 = vpop.eup %2273  ;;  %v3411_v42 = vld [vmem:[#allocation33_spill] sm:$0xff] }
 0x397   :  { %v3156_v32 = vadd.f32 %v1378_v23, %v1376_v28  ;;  %v1372_v60 = vadd.f32 1.0, %v2274_v35  ;;  %v467_v40 = vadd.f32 %v3411_v42, %v2963_v24 }
 0x398   :  { %2281 = vrcp.f32 %v1359_v57 }
 0x399   :  { %v2276_v11 = vpop.eup %2275  ;;  %2283 = vrcp.f32 %v1372_v60  ;;  %v3413_v60 = vld [vmem:[#allocation36_spill] sm:$0xff] }
 0x39a   :  { %v1373_v55 = vadd.f32 1.0, %v2276_v11  ;;  %2285 = vtanh.f32 %v3156_v32 }
 0x39b   :  { %v2278_v48 = vpop.eup %2277 }
 0x39c   :  { %v2280_v17 = vpop.eup %2279  ;;  %2287 = vrcp.f32 %v1373_v55 }
 0x39d   :  { %v1379_v20 = vmul.f32 %v2280_v17, %v2278_v48  ;;  %v3412_v48 = vld [vmem:[#allocation35_spill] sm:$0xff] }
 0x39e   :  { %v2282_v8 = vpop.eup %2281  ;;  %v495_v17 = vadd.f32 %v3412_v48, %v2973_v7 }
 0x39f   :  { %v1377_v5 = vmul.f32 %v2282_v8, %v3104_v54  ;;  %v2284_v27 = vpop.eup %2283  ;;  %v3410_v54 = vld [vmem:[#allocation32_spill] sm:$0xff]  ;;  %v3414_v8 = vld [vmem:[#allocation37_spill] sm:$0xff] }
 0x3a0   :  { %v2286_v43 = vpop.eup %2285  ;;  %v453_v44 = vadd.f32 %v3410_v54, %v2961_v16  ;;  %v469_v55 = vadd.f32 %v3414_v8, %v2963_v24 }
 0x3a1   :  { %v3160_v6 = vadd.f32 %v1379_v20, %v1377_v5  ;;  %v1384_v45 = vmul.f32 %v2286_v43, %v2284_v27  ;;  %v455_v20 = vadd.f32 %v3413_v60, %v2961_v16  ;;  %v3415_v43 = vld [vmem:[#allocation34_spill] sm:$0xff] }
 0x3a2   :  { %v2288_v53 = vpop.eup %2287 }
 0x3a3   :  { %2289 = vtanh.f32 %v3160_v6 }
 0x3a9   :  { %v2290_v29 = vpop.eup %2289 }
 0x3aa   :  { %v1385_v63 = vmul.f32 %v2290_v29, %v2288_v53  ;;  %v481_v53 = vadd.f32 %v3415_v43, %v2975_v4 }
 0x3ac   :  { %v1394_v41 = vpack.c.bf16 %v1385_v63, %v1384_v45 }
 0x3ae   :  { %1403 = vmatmul.bf16.vlgmr.msra.gmra.mxu0 %v1394_v41  ;;  %1417 = vmatmul.bf16.vlgmr.msra.gmra.mxu1 %v1394_v41 }
 0x3af   :  { %1431 = vmatmul.bf16.vlgmr.msra.gmra.mxu2 %v1394_v41  ;;  %1445 = vmatmul.bf16.vlgmr.msra.gmra.mxu3 %v1394_v41 }
 0x3b0   :  { %1625 = vmatpush.bf16.msra.mxu0 %v2666_v61  ;;  %1639 = vmatpush.bf16.msra.mxu1 %v2668_v62 }
 0x3b1   :  { %1653 = vmatpush.bf16.msra.mxu2 %v2670_v1  ;;  %1667 = vmatpush.bf16.msra.mxu3 %v2672_v2 }
 0x3b4   :  { %1626 = vmatpush.bf16.msra.mxu0 %v2680_v9  ;;  %1640 = vmatpush.bf16.msra.mxu1 %v2682_v10 }
 0x3b5   :  { %1654 = vmatpush.bf16.msra.mxu2 %v2686_v13  ;;  %1668 = vmatpush.bf16.msra.mxu3 %v2688_v14 }
 0x3b8   :  { %1627 = vmatpush.bf16.msra.mxu0 %v2692_v21  ;;  %1641 = vmatpush.bf16.msra.mxu1 %v2694_v22 }
 0x3b9   :  { %1655 = vmatpush.bf16.msra.mxu2 %v2698_v25  ;;  %1669 = vmatpush.bf16.msra.mxu3 %v2700_v26 }
 0x3bc   :  { %1628 = vmatpush.bf16.msra.mxu0 %v2704_v33  ;;  %1642 = vmatpush.bf16.msra.mxu1 %v2706_v34 }
 0x3bd   :  { %1656 = vmatpush.bf16.msra.mxu2 %v2710_v37  ;;  %1670 = vmatpush.bf16.msra.mxu3 %v2712_v38 }
 0x3c0   :  { %1629 = vmatpush.bf16.msra.mxu0 %v2716_v46  ;;  %1643 = vmatpush.bf16.msra.mxu1 %v2718_v47 }
 0x3c1   :  { %1657 = vmatpush.bf16.msra.mxu2 %v2722_v50  ;;  %1671 = vmatpush.bf16.msra.mxu3 %v2724_v51 }
 0x3c4   :  { %1630 = vmatpush.bf16.msra.mxu0 %v2732_v58  ;;  %1644 = vmatpush.bf16.msra.mxu1 %v2734_v59 }
 0x3c5   :  { %1658 = vmatpush.bf16.msra.mxu2 %v2738_v0  ;;  %1672 = vmatpush.bf16.msra.mxu3 %v2740_v3 }
 0x3c8   :  { %1631 = vmatpush.bf16.msra.mxu0 %v2744_v12  ;;  %1645 = vmatpush.bf16.msra.mxu1 %v2746_v15 }
 0x3c9   :  { %1659 = vmatpush.bf16.msra.mxu2 %v2750_v18  ;;  %1673 = vmatpush.bf16.msra.mxu3 %v2752_v19 }
 0x3cc   :  { %1632 = vmatpush.bf16.msra.mxu0 %v2756_v30  ;;  %1646 = vmatpush.bf16.msra.mxu1 %v2758_v31 }
 0x3cd   :  { %1660 = vmatpush.bf16.msra.mxu2 %v2766_v36  ;;  %1674 = vmatpush.bf16.msra.mxu3 %v2768_v39 }
 0x42b   :  { %v1404_v49 = vpop.f32.mrf.mxu0  ;;  %v1418_v56 = vpop.f32.mrf.mxu1 }
 0x42c   :  { %v1451_v23 = vadd.f32 %v1404_v49, %v453_v44  ;;  %v1452_v52 = vadd.f32 %v1418_v56, %v467_v40 }
 0x42e   :  { %v1459_v28 = vsub.f32 0.0, %v1451_v23  ;;  %v1460_v57 = vsub.f32 0.0, %v1452_v52 }
 0x430   :  { %v1463_v35 = vmul.f32 1.442695, %v1459_v28  ;;  %v1465_v11 = vmul.f32 1.442695, %v1460_v57  ;;  %v3416_v28 = vld [vmem:[#allocation39_spill] sm:$0xff] }
 0x431   :  { %v497_v57 = vadd.f32 %v3416_v28, %v2973_v7 }
 0x432   :  { %2291 = vpow2.f32 %v1463_v35  ;;  %v1432_v5 = vpop.f32.mrf.mxu2  ;;  %v1446_v27 = vpop.f32.mrf.mxu3 }
 0x433   :  { %2293 = vpow2.f32 %v1465_v11  ;;  %v1406_v29 = vpop.f32.mrf.mxu0  ;;  %v1420_v45 = vpop.f32.mrf.mxu1  ;;  %v1454_v63 = vadd.f32 %v1446_v27, %v495_v17  ;;  %v1453_v44 = vadd.f32 %v1432_v5, %v481_v53  ;;  %v3417_v17 = vld [vmem:[#allocation38_spill] sm:$0xff] }
 0x434   :  { %v1455_v41 = vadd.f32 %v1406_v29, %v455_v20  ;;  %v1456_v54 = vadd.f32 %v1420_v45, %v469_v55  ;;  %v483_v20 = vadd.f32 %v3417_v17, %v2975_v4 }
 0x435   :  { %v1481_v56 = vsub.f32 0.0, %v1454_v63  ;;  %2295 = vtanh.f32 %v1453_v44 }
 0x436   :  { %v1461_v42 = vsub.f32 0.0, %v1455_v41  ;;  %v1462_v40 = vsub.f32 0.0, %v1456_v54 }
 0x437   :  { %v1483_v5 = vmul.f32 1.442695, %v1481_v56 }
 0x438   :  { %v2292_v49 = vpop.eup %2291  ;;  %v1467_v23 = vmul.f32 1.442695, %v1461_v42  ;;  %v1469_v48 = vmul.f32 1.442695, %v1462_v40 }
 0x439   :  { %v2294_v52 = vpop.eup %2293  ;;  %v1471_v35 = vadd.f32 1.0, %v2292_v49 }
 0x43a   :  { %v1472_v60 = vadd.f32 1.0, %v2294_v52  ;;  %2297 = vpow2.f32 %v1467_v23  ;;  %v1434_v11 = vpop.f32.mrf.mxu2  ;;  %v1448_v8 = vpop.f32.mrf.mxu3 }
 0x43b   :  { %2299 = vrcp.f32 %v1471_v35  ;;  %v1458_v55 = vadd.f32 %v1448_v8, %v497_v57  ;;  %v1457_v27 = vadd.f32 %v1434_v11, %v483_v20  ;;  %v2296_v53 = vpop.eup %2295 }
 0x43c   :  { %2301 = vrcp.f32 %v1472_v60 }
 0x43d   :  { %2303 = vpow2.f32 %v1469_v48  ;;  %v1482_v43 = vsub.f32 0.0, %v1458_v55 }
 0x43e   :  { %2305 = vpow2.f32 %v1483_v5 }
 0x43f   :  { %v1485_v29 = vmul.f32 1.442695, %v1482_v43  ;;  %2307 = vtanh.f32 %v1457_v27 }
 0x440   :  { %v2298_v45 = vpop.eup %2297 }
 0x441   :  { %v2300_v63 = vpop.eup %2299  ;;  %v1473_v41 = vadd.f32 1.0, %v2298_v45  ;;  %2309 = vpow2.f32 %v1485_v29  ;;  %v3424_v45 = vld [vmem:[#allocation47_spill] sm:$0xff] }
 0x442   :  { %v2302_v54 = vpop.eup %2301  ;;  %v1493_v44 = vmul.f32 %v2300_v63, %v2296_v53  ;;  %v573_v63 = vadd.f32 %v3424_v45, %v2973_v7 }
 0x443   :  { %v2304_v42 = vpop.eup %2303  ;;  %v1491_v40 = vmul.f32 %v2302_v54, %v3156_v32  ;;  %2311 = vrcp.f32 %v1473_v41 }
 0x444   :  { %v1474_v49 = vadd.f32 1.0, %v2304_v42  ;;  %v2306_v56 = vpop.eup %2305 }
 0x445   :  { %v3212_v23 = vadd.f32 %v1493_v44, %v1491_v40  ;;  %v2308_v52 = vpop.eup %2307  ;;  %v1487_v35 = vadd.f32 1.0, %v2306_v56 }
 0x446   :  { %2313 = vrcp.f32 %v1474_v49  ;;  %v3425_v49 = vld [vmem:[#allocation46_spill] sm:$0xff] }
 0x447   :  { %v2310_v28 = vpop.eup %2309  ;;  %2315 = vrcp.f32 %v1487_v35  ;;  %v559_v56 = vadd.f32 %v3425_v49, %v2975_v4 }
 0x448   :  { %v1488_v11 = vadd.f32 1.0, %v2310_v28  ;;  %2317 = vtanh.f32 %v3212_v23 }
 0x449   :  { %v2312_v57 = vpop.eup %2311 }
 0x44a   :  { %v1494_v48 = vmul.f32 %v2312_v57, %v2308_v52  ;;  %2319 = vrcp.f32 %v1488_v11 }
 0x44c   :  { %v2314_v60 = vpop.eup %2313 }
 0x44d   :  { %v1492_v8 = vmul.f32 %v2314_v60, %v3160_v6  ;;  %v2316_v32 = vpop.eup %2315 }
 0x44e   :  { %v2318_v20 = vpop.eup %2317 }
 0x44f   :  { %v3216_v17 = vadd.f32 %v1494_v48, %v1492_v8  ;;  %v1499_v27 = vmul.f32 %v2318_v20, %v2316_v32 }
 0x450   :  { %v2320_v55 = vpop.eup %2319 }
 0x451   :  { %2321 = vtanh.f32 %v3216_v17 }
 0x457   :  { %v2322_v5 = vpop.eup %2321 }
 0x458   :  { %v1500_v43 = vmul.f32 %v2322_v5, %v2320_v55 }
 0x45a   :  { %v1509_v53 = vpack.c.bf16 %v1500_v43, %v1499_v27 }
 0x45c   :  { %1518 = vmatmul.bf16.vlgmr.msrb.gmra.mxu0 %v1509_v53  ;;  %1532 = vmatmul.bf16.vlgmr.msrb.gmra.mxu1 %v1509_v53 }
 0x45d   :  { %1546 = vmatmul.bf16.vlgmr.msrb.gmra.mxu2 %v1509_v53  ;;  %1560 = vmatmul.bf16.vlgmr.msrb.gmra.mxu3 %v1509_v53 }
 0x45e   :  { %1740 = vmatpush.bf16.msrb.mxu0 %v2666_v61  ;;  %1754 = vmatpush.bf16.msrb.mxu1 %v2668_v62  ;;  %v3418_v61 = vld [vmem:[#allocation40_spill] sm:$0xff] }
 0x45f   :  { %1768 = vmatpush.bf16.msrb.mxu2 %v2670_v1  ;;  %1782 = vmatpush.bf16.msrb.mxu3 %v2672_v2  ;;  %v529_v62 = vadd.f32 %v3418_v61, %v2961_v16  ;;  %v3419_v1 = vld [vmem:[#allocation41_spill] sm:$0xff] }
 0x460   :  { %v543_v2 = vadd.f32 %v3419_v1, %v2963_v24 }
 0x462   :  { %1741 = vmatpush.bf16.msrb.mxu0 %v2680_v9  ;;  %1755 = vmatpush.bf16.msrb.mxu1 %v2682_v10 }
 0x463   :  { %1769 = vmatpush.bf16.msrb.mxu2 %v2686_v13  ;;  %1783 = vmatpush.bf16.msrb.mxu3 %v2688_v14 }
 0x466   :  { %1742 = vmatpush.bf16.msrb.mxu0 %v2692_v21  ;;  %1756 = vmatpush.bf16.msrb.mxu1 %v2694_v22 }
 0x467   :  { %1770 = vmatpush.bf16.msrb.mxu2 %v2698_v25  ;;  %1784 = vmatpush.bf16.msrb.mxu3 %v2700_v26 }
 0x46a   :  { %1743 = vmatpush.bf16.msrb.mxu0 %v2704_v33  ;;  %1757 = vmatpush.bf16.msrb.mxu1 %v2706_v34  ;;  %v3420_v33 = vld [vmem:[#allocation43_spill] sm:$0xff] }
 0x46b   :  { %1771 = vmatpush.bf16.msrb.mxu2 %v2710_v37  ;;  %1785 = vmatpush.bf16.msrb.mxu3 %v2712_v38  ;;  %v571_v34 = vadd.f32 %v3420_v33, %v2973_v7  ;;  %v3421_v37 = vld [vmem:[#allocation44_spill] sm:$0xff] }
 0x46c   :  { %v531_v38 = vadd.f32 %v3421_v37, %v2961_v16 }
 0x46e   :  { %1744 = vmatpush.bf16.msrb.mxu0 %v2716_v46  ;;  %1758 = vmatpush.bf16.msrb.mxu1 %v2718_v47  ;;  %v3422_v46 = vld [vmem:[#allocation45_spill] sm:$0xff] }
 0x46f   :  { %1772 = vmatpush.bf16.msrb.mxu2 %v2722_v50  ;;  %1786 = vmatpush.bf16.msrb.mxu3 %v2724_v51  ;;  %v545_v47 = vadd.f32 %v3422_v46, %v2963_v24 }
 0x472   :  { %1745 = vmatpush.bf16.msrb.mxu0 %v2732_v58  ;;  %1759 = vmatpush.bf16.msrb.mxu1 %v2734_v59  ;;  %v3423_v58 = vld [vmem:[#allocation42_spill] sm:$0xff] }
 0x473   :  { %1773 = vmatpush.bf16.msrb.mxu2 %v2738_v0  ;;  %1787 = vmatpush.bf16.msrb.mxu3 %v2740_v3  ;;  %v557_v59 = vadd.f32 %v3423_v58, %v2975_v4 }
 0x476   :  { %1746 = vmatpush.bf16.msrb.mxu0 %v2744_v12  ;;  %1760 = vmatpush.bf16.msrb.mxu1 %v2746_v15 }
 0x477   :  { %1774 = vmatpush.bf16.msrb.mxu2 %v2750_v18  ;;  %1788 = vmatpush.bf16.msrb.mxu3 %v2752_v19 }
 0x47a   :  { %1747 = vmatpush.bf16.msrb.mxu0 %v2756_v30  ;;  %1761 = vmatpush.bf16.msrb.mxu1 %v2758_v31 }
 0x47b   :  { %1775 = vmatpush.bf16.msrb.mxu2 %v2766_v36  ;;  %1789 = vmatpush.bf16.msrb.mxu3 %v2768_v39 }
 0x4d9   :  { %v1519_v9 = vpop.f32.mrf.mxu0  ;;  %v1533_v10 = vpop.f32.mrf.mxu1 }
 0x4da   :  { %v1566_v13 = vadd.f32 %v1519_v9, %v529_v62  ;;  %v1567_v14 = vadd.f32 %v1533_v10, %v543_v2 }
 0x4dc   :  { %v1574_v21 = vsub.f32 0.0, %v1566_v13  ;;  %v1575_v22 = vsub.f32 0.0, %v1567_v14 }
 0x4de   :  { %v1578_v25 = vmul.f32 1.442695, %v1574_v21  ;;  %v1580_v26 = vmul.f32 1.442695, %v1575_v22 }
 0x4e0   :  { %2323 = vpow2.f32 %v1578_v25  ;;  %v1547_v50 = vpop.f32.mrf.mxu2  ;;  %v1561_v51 = vpop.f32.mrf.mxu3 }
 0x4e1   :  { %2325 = vpow2.f32 %v1580_v26  ;;  %v1521_v0 = vpop.f32.mrf.mxu0  ;;  %v1535_v3 = vpop.f32.mrf.mxu1  ;;  %v1569_v12 = vadd.f32 %v1561_v51, %v571_v34  ;;  %v1568_v19 = vadd.f32 %v1547_v50, %v557_v59 }
 0x4e2   :  { %v1570_v15 = vadd.f32 %v1521_v0, %v531_v38  ;;  %v1571_v18 = vadd.f32 %v1535_v3, %v545_v47  ;;  %v3427_v47 = vld [vmem:[#allocation49_spill] sm:$0xff] }
 0x4e3   :  { %v1596_v39 = vsub.f32 0.0, %v1569_v12  ;;  %2327 = vtanh.f32 %v1568_v19  ;;  %v619_v50 = vadd.f32 %v3427_v47, %v2963_v24  ;;  %v3428_v19 = vld [vmem:[#allocation51_spill] sm:$0xff] }
 0x4e4   :  { %v1576_v30 = vsub.f32 0.0, %v1570_v15  ;;  %v1577_v31 = vsub.f32 0.0, %v1571_v18 }
 0x4e5   :  { %v1598_v28 = vmul.f32 1.442695, %v1596_v39  ;;  %v3430_v39 = vld [vmem:[#allocation53_spill] sm:$0xff] }
 0x4e6   :  { %v2324_v36 = vpop.eup %2323  ;;  %v1582_v6 = vmul.f32 1.442695, %v1576_v30  ;;  %v1584_v54 = vmul.f32 1.442695, %v1577_v31  ;;  %v647_v30 = vadd.f32 %v3428_v19, %v2973_v7  ;;  %v3429_v31 = vld [vmem:[#allocation52_spill] sm:$0xff] }
 0x4e7   :  { %v2326_v29 = vpop.eup %2325  ;;  %v1586_v41 = vadd.f32 1.0, %v2324_v36  ;;  %v607_v36 = vadd.f32 %v3429_v31, %v2961_v16 }
 0x4e8   :  { %v1587_v44 = vadd.f32 1.0, %v2326_v29  ;;  %2329 = vpow2.f32 %v1582_v6  ;;  %v1549_v42 = vpop.f32.mrf.mxu2  ;;  %v1563_v40 = vpop.f32.mrf.mxu3  ;;  %v621_v6 = vadd.f32 %v3430_v39, %v2963_v24 }
 0x4e9   :  { %2331 = vrcp.f32 %v1586_v41  ;;  %v1573_v52 = vadd.f32 %v1563_v40, %v573_v63  ;;  %v1572_v57 = vadd.f32 %v1549_v42, %v559_v56  ;;  %v2328_v48 = vpop.eup %2327  ;;  %v3431_v63 = vld [vmem:[#allocation50_spill] sm:$0xff] }
 0x4ea   :  { %2333 = vrcp.f32 %v1587_v44  ;;  %v633_v41 = vadd.f32 %v3431_v63, %v2975_v4 }
 0x4eb   :  { %2335 = vpow2.f32 %v1584_v54  ;;  %v1597_v35 = vsub.f32 0.0, %v1573_v52 }
 0x4ec   :  { %2337 = vpow2.f32 %v1598_v28 }
 0x4ed   :  { %v1600_v60 = vmul.f32 1.442695, %v1597_v35  ;;  %2339 = vtanh.f32 %v1572_v57 }
 0x4ee   :  { %v2330_v11 = vpop.eup %2329 }
 0x4ef   :  { %v2332_v8 = vpop.eup %2331  ;;  %v1588_v32 = vadd.f32 1.0, %v2330_v11  ;;  %2341 = vpow2.f32 %v1600_v60  ;;  %v3432_v11 = vld [vmem:[#allocation55_spill] sm:$0xff] }
 0x4f0   :  { %v2334_v20 = vpop.eup %2333  ;;  %v1608_v55 = vmul.f32 %v2332_v8, %v2328_v48  ;;  %v649_v8 = vadd.f32 %v3432_v11, %v2973_v7 }
 0x4f1   :  { %v2336_v5 = vpop.eup %2335  ;;  %v1606_v27 = vmul.f32 %v2334_v20, %v3212_v23  ;;  %2343 = vrcp.f32 %v1588_v32 }
 0x4f2   :  { %v1589_v43 = vadd.f32 1.0, %v2336_v5  ;;  %v2338_v61 = vpop.eup %2337 }
 0x4f3   :  { %v3268_v53 = vadd.f32 %v1608_v55, %v1606_v27  ;;  %v2340_v62 = vpop.eup %2339  ;;  %v1602_v9 = vadd.f32 1.0, %v2338_v61 }
 0x4f4   :  { %2345 = vrcp.f32 %v1589_v43  ;;  %v3433_v43 = vld [vmem:[#allocation54_spill] sm:$0xff] }
 0x4f5   :  { %v2342_v1 = vpop.eup %2341  ;;  %2347 = vrcp.f32 %v1602_v9  ;;  %v635_v61 = vadd.f32 %v3433_v43, %v2975_v4 }
 0x4f6   :  { %v1603_v14 = vadd.f32 1.0, %v2342_v1  ;;  %2349 = vtanh.f32 %v3268_v53 }
 0x4f7   :  { %v2344_v2 = vpop.eup %2343 }
 0x4f8   :  { %v1609_v10 = vmul.f32 %v2344_v2, %v2340_v62  ;;  %2351 = vrcp.f32 %v1603_v14 }
 0x4fa   :  { %v2346_v13 = vpop.eup %2345 }
 0x4fb   :  { %v1607_v21 = vmul.f32 %v2346_v13, %v3216_v17  ;;  %v2348_v23 = vpop.eup %2347  ;;  %v3426_v17 = vld [vmem:[#allocation48_spill] sm:$0xff] }
 0x4fc   :  { %v2350_v25 = vpop.eup %2349  ;;  %v605_v46 = vadd.f32 %v3426_v17, %v2961_v16 }
 0x4fd   :  { %v3272_v22 = vadd.f32 %v1609_v10, %v1607_v21  ;;  %v1614_v34 = vmul.f32 %v2350_v25, %v2348_v23 }
 0x4fe   :  { %v2352_v26 = vpop.eup %2351 }
 0x4ff   :  { %2353 = vtanh.f32 %v3272_v22 }
 0x505   :  { %v2354_v33 = vpop.eup %2353 }
 0x506   :  { %v1615_v37 = vmul.f32 %v2354_v33, %v2352_v26 }
 0x508   :  { %v1624_v38 = vpack.c.bf16 %v1615_v37, %v1614_v34 }
 0x50a   :  { %1633 = vmatmul.bf16.vlgmr.msra.gmra.mxu0 %v1624_v38  ;;  %1647 = vmatmul.bf16.vlgmr.msra.gmra.mxu1 %v1624_v38 }
 0x50b   :  { %1661 = vmatmul.bf16.vlgmr.msra.gmra.mxu2 %v1624_v38  ;;  %1675 = vmatmul.bf16.vlgmr.msra.gmra.mxu3 %v1624_v38 }
 0x587   :  { %v1634_v51 = vpop.f32.mrf.mxu0  ;;  %v1648_v58 = vpop.f32.mrf.mxu1 }
 0x588   :  { %v1681_v59 = vadd.f32 %v1634_v51, %v605_v46  ;;  %v1682_v0 = vadd.f32 %v1648_v58, %v619_v50 }
 0x58a   :  { %v1689_v3 = vsub.f32 0.0, %v1681_v59  ;;  %v1690_v12 = vsub.f32 0.0, %v1682_v0 }
 0x58c   :  { %v1693_v15 = vmul.f32 1.442695, %v1689_v3  ;;  %v1695_v18 = vmul.f32 1.442695, %v1690_v12 }
 0x58e   :  { %2355 = vpow2.f32 %v1693_v15  ;;  %v1662_v29 = vpop.f32.mrf.mxu2  ;;  %v1676_v45 = vpop.f32.mrf.mxu3 }
 0x58f   :  { %2357 = vpow2.f32 %v1695_v18  ;;  %v1636_v54 = vpop.f32.mrf.mxu0  ;;  %v1650_v44 = vpop.f32.mrf.mxu1  ;;  %v1684_v42 = vadd.f32 %v1676_v45, %v647_v30  ;;  %v1683_v56 = vadd.f32 %v1662_v29, %v633_v41 }
 0x590   :  { %v1685_v40 = vadd.f32 %v1636_v54, %v607_v36  ;;  %v1686_v49 = vadd.f32 %v1650_v44, %v621_v6  ;;  %v3435_v6 = vld [vmem:[#allocation57_spill] sm:$0xff] }
 0x591   :  { %v1711_v35 = vsub.f32 0.0, %v1684_v42  ;;  %2359 = vtanh.f32 %v1683_v56  ;;  %v695_v29 = vadd.f32 %v3435_v6, %v2963_v24  ;;  %v3436_v56 = vld [vmem:[#allocation59_spill] sm:$0xff] }
 0x592   :  { %v1691_v52 = vsub.f32 0.0, %v1685_v40  ;;  %v1692_v28 = vsub.f32 0.0, %v1686_v49 }
 0x593   :  { %v1713_v1 = vmul.f32 1.442695, %v1711_v35  ;;  %v3438_v35 = vld [vmem:[#allocation60_spill] sm:$0xff] }
 0x594   :  { %v2356_v57 = vpop.eup %2355  ;;  %v1697_v48 = vmul.f32 1.442695, %v1691_v52  ;;  %v1699_v20 = vmul.f32 1.442695, %v1692_v28  ;;  %v723_v52 = vadd.f32 %v3436_v56, %v2973_v7  ;;  %v3437_v28 = vld [vmem:[#allocation58_spill] sm:$0xff] }
 0x595   :  { %v2358_v60 = vpop.eup %2357  ;;  %v1701_v32 = vadd.f32 1.0, %v2356_v57  ;;  %v709_v57 = vadd.f32 %v3437_v28, %v2975_v4  ;;  %v1857_v28 = vstv %s3334_s5 }
 0x596   :  { %v1702_v55 = vadd.f32 1.0, %v2358_v60  ;;  %2361 = vpow2.f32 %v1697_v48  ;;  %v1664_v5 = vpop.f32.mrf.mxu2  ;;  %v1678_v27 = vpop.f32.mrf.mxu3  ;;  %v683_v48 = vadd.f32 %v3438_v35, %v2961_v16  ;;  %v3439_v60 = vld [vmem:[#allocation61_spill] sm:$0xff] }
 0x597   :  { %2363 = vrcp.f32 %v1701_v32  ;;  %v1688_v62 = vadd.f32 %v1678_v27, %v649_v8  ;;  %v1687_v2 = vadd.f32 %v1664_v5, %v635_v61  ;;  %v2360_v10 = vpop.eup %2359  ;;  %v697_v11 = vadd.f32 %v3439_v60, %v2963_v24  ;;  %v3440_v24 = vld [vmem:[#allocation63_spill] sm:$0xff] }
 0x598   :  { %2365 = vrcp.f32 %v1702_v55 }
 0x599   :  { %2367 = vpow2.f32 %v1699_v20  ;;  %v1712_v9 = vsub.f32 0.0, %v1688_v62 }
 0x59a   :  { %2369 = vpow2.f32 %v1713_v1 }
 0x59b   :  { %v1715_v13 = vmul.f32 1.442695, %v1712_v9  ;;  %2371 = vtanh.f32 %v1687_v2 }
 0x59c   :  { %v2362_v14 = vpop.eup %2361 }
 0x59d   :  { %v2364_v21 = vpop.eup %2363  ;;  %v1703_v23 = vadd.f32 1.0, %v2362_v14  ;;  %2373 = vpow2.f32 %v1715_v13  ;;  %v725_v14 = vadd.f32 %v3440_v24, %v2973_v7 }
 0x59e   :  { %v2366_v25 = vpop.eup %2365  ;;  %v1723_v26 = vmul.f32 %v2364_v21, %v2360_v10 }
 0x59f   :  { %v2368_v33 = vpop.eup %2367  ;;  %v1721_v34 = vmul.f32 %v2366_v25, %v3268_v53  ;;  %2375 = vrcp.f32 %v1703_v23 }
 0x5a0   :  { %v1704_v37 = vadd.f32 1.0, %v2368_v33  ;;  %v2370_v17 = vpop.eup %2369 }
 0x5a1   :  { %v3292_v38 = vadd.f32 %v1723_v26, %v1721_v34  ;;  %v2372_v46 = vpop.eup %2371  ;;  %v1717_v51 = vadd.f32 1.0, %v2370_v17  ;;  %v3441_v34 = vld [vmem:[#allocation62_spill] sm:$0xff] }
 0x5a2   :  { %2377 = vrcp.f32 %v1704_v37  ;;  %v711_v37 = vadd.f32 %v3441_v34, %v2975_v4 }
 0x5a3   :  { %v2374_v47 = vpop.eup %2373  ;;  %2379 = vrcp.f32 %v1717_v51 }
 0x5a4   :  { %v1718_v0 = vadd.f32 1.0, %v2374_v47  ;;  %2381 = vtanh.f32 %v3292_v38 }
 0x5a5   :  { %v2376_v50 = vpop.eup %2375 }
 0x5a6   :  { %v1724_v58 = vmul.f32 %v2376_v50, %v2372_v46  ;;  %2383 = vrcp.f32 %v1718_v0 }
 0x5a8   :  { %v2378_v59 = vpop.eup %2377 }
 0x5a9   :  { %v1722_v3 = vmul.f32 %v2378_v59, %v3272_v22  ;;  %v2380_v53 = vpop.eup %2379  ;;  %v3434_v22 = vld [vmem:[#allocation56_spill] sm:$0xff] }
 0x5aa   :  { %v2382_v15 = vpop.eup %2381  ;;  %v681_v39 = vadd.f32 %v3434_v22, %v2961_v16 }
 0x5ab   :  { %v3296_v12 = vadd.f32 %v1724_v58, %v1722_v3  ;;  %v1729_v30 = vmul.f32 %v2382_v15, %v2380_v53 }
 0x5ac   :  { %v2384_v18 = vpop.eup %2383 }
 0x5ad   :  { %2385 = vtanh.f32 %v3296_v12 }
 0x5b3   :  { %v2386_v19 = vpop.eup %2385 }
 0x5b4   :  { %v1730_v31 = vmul.f32 %v2386_v19, %v2384_v18 }
 0x5b6   :  { %v1739_v36 = vpack.c.bf16 %v1730_v31, %v1729_v30 }
 0x5b8   :  { %1748 = vmatmul.bf16.vlgmr.msrb.gmra.mxu0 %v1739_v36  ;;  %1762 = vmatmul.bf16.vlgmr.msrb.gmra.mxu1 %v1739_v36 }
 0x5b9   :  { %1776 = vmatmul.bf16.vlgmr.msrb.gmra.mxu2 %v1739_v36  ;;  %1790 = vmatmul.bf16.vlgmr.msrb.gmra.mxu3 %v1739_v36 }
 0x635   :  { %v1749_v45 = vpop.f32.mrf.mxu0  ;;  %v1763_v63 = vpop.f32.mrf.mxu1 }
 0x636   :  { %v1796_v41 = vadd.f32 %v1749_v45, %v681_v39  ;;  %v1797_v54 = vadd.f32 %v1763_v63, %v695_v29  ;;  %v2162_v63 = vld [vmem:[%s3333_s4] ss:$0 sm:$0xff] }
 0x638   :  { %v1804_v44 = vsub.f32 0.0, %v1796_v41  ;;  %v1805_v42 = vsub.f32 0.0, %v1797_v54 }
 0x63a   :  { %v1808_v40 = vmul.f32 1.442695, %v1804_v44  ;;  %v1810_v49 = vmul.f32 1.442695, %v1805_v42 }
 0x63c   :  { %2387 = vpow2.f32 %v1808_v40  ;;  %v1777_v8 = vpop.f32.mrf.mxu2  ;;  %v1791_v32 = vpop.f32.mrf.mxu3 }
 0x63d   :  { %2389 = vpow2.f32 %v1810_v49  ;;  %v1799_v20 = vadd.f32 %v1791_v32, %v723_v52  ;;  %v1751_v55 = vpop.f32.mrf.mxu0  ;;  %v1765_v5 = vpop.f32.mrf.mxu1  ;;  %v1798_v27 = vadd.f32 %v1777_v8, %v709_v57 }
 0x63e   :  { %v1800_v43 = vadd.f32 %v1751_v55, %v683_v48  ;;  %v1801_v61 = vadd.f32 %v1765_v5, %v697_v11 }
 0x63f   :  { %v1826_v62 = vsub.f32 0.0, %v1799_v20  ;;  %2391 = vtanh.f32 %v1798_v27 }
 0x640   :  { %v1806_v1 = vsub.f32 0.0, %v1800_v43  ;;  %v1807_v2 = vsub.f32 0.0, %v1801_v61 }
 0x641   :  { %v1828_v9 = vmul.f32 1.442695, %v1826_v62 }
 0x642   :  { %v2388_v10 = vpop.eup %2387  ;;  %v1812_v16 = vmul.f32 1.442695, %v1806_v1  ;;  %v1814_v23 = vmul.f32 1.442695, %v1807_v2 }
 0x643   :  { %v2390_v13 = vpop.eup %2389  ;;  %v1816_v21 = vadd.f32 1.0, %v2388_v10  ;;  %2393 = vpow2.f32 %v1828_v9 }
 0x644   :  { %v1817_v25 = vadd.f32 1.0, %v2390_v13  ;;  %2395 = vpow2.f32 %v1812_v16  ;;  %v1779_v26 = vpop.f32.mrf.mxu2  ;;  %v1793_v33 = vpop.f32.mrf.mxu3 }
 0x645   :  { %2397 = vrcp.f32 %v1816_v21  ;;  %v1803_v17 = vadd.f32 %v1793_v33, %v725_v14  ;;  %v1802_v46 = vadd.f32 %v1779_v26, %v711_v37  ;;  %v2392_v50 = vpop.eup %2391 }
 0x646   :  { %2399 = vrcp.f32 %v1817_v25 }
 0x647   :  { %2401 = vpow2.f32 %v1814_v23  ;;  %v1827_v47 = vsub.f32 0.0, %v1803_v17 }
 0x648   :  { %2403 = vtanh.f32 %v1802_v46 }
 0x649   :  { %v2394_v51 = vpop.eup %2393  ;;  %v1830_v58 = vmul.f32 1.442695, %v1827_v47 }
 0x64a   :  { %v2396_v7 = vpop.eup %2395  ;;  %v1832_v0 = vadd.f32 1.0, %v2394_v51 }
 0x64b   :  { %v2398_v59 = vpop.eup %2397  ;;  %v1818_v3 = vadd.f32 1.0, %v2396_v7  ;;  %2405 = vpow2.f32 %v1830_v58 }
 0x64c   :  { %v2400_v53 = vpop.eup %2399  ;;  %v1838_v15 = vmul.f32 %v2398_v59, %v2392_v50 }
 0x64d   :  { %v2402_v18 = vpop.eup %2401  ;;  %v1836_v4 = vmul.f32 %v2400_v53, %v3292_v38  ;;  %2407 = vrcp.f32 %v1818_v3 }
 0x64e   :  { %v1819_v19 = vadd.f32 1.0, %v2402_v18  ;;  %2409 = vrcp.f32 %v1832_v0  ;;  %v2404_v31 = vpop.eup %2403 }
 0x64f   :  { %v1840_v30 = vadd.f32 %v1838_v15, %v1836_v4 }
 0x650   :  { %2411 = vrcp.f32 %v1819_v19 }
 0x651   :  { %2413 = vtanh.f32 %v1840_v30  ;;  %v2406_v36 = vpop.eup %2405 }
 0x652   :  { %v1833_v45 = vadd.f32 1.0, %v2406_v36 }
 0x653   :  { %v2408_v22 = vpop.eup %2407 }
 0x654   :  { %v1839_v39 = vmul.f32 %v2408_v22, %v2404_v31  ;;  %v2410_v6 = vpop.eup %2409  ;;  %2415 = vrcp.f32 %v1833_v45 }
 0x656   :  { %v2412_v29 = vpop.eup %2411 }
 0x657   :  { %v2414_v41 = vpop.eup %2413  ;;  %v1837_v38 = vmul.f32 %v2412_v29, %v3296_v12 }
 0x658   :  { %v1844_v54 = vmul.f32 %v2414_v41, %v2410_v6 }
 0x659   :  { %v1841_v44 = vadd.f32 %v1839_v39, %v1837_v38 }
 0x65a   :  { %v1850_v42 = vmul.f32 %v2162_v63, %v1844_v54  ;;  %v2416_v40 = vpop.eup %2415 }
 0x65b   :  { %2417 = vtanh.f32 %v1841_v44 }
 0x65c   :  { %1852 = vadd.xlane.f32.xlu0 %v1850_v42 }
 0x661   :  { %v2418_v49 = vpop.eup %2417 }
 0x662   :  { %v1845_v56 = vmul.f32 %v2418_v49, %v2416_v40 }
 0x664   :  { %v1851_v52 = vmul.f32 %v2162_v63, %v1845_v56 }
 0x666   :  { %1854 = vadd.xlane.f32.xlu1 %v1851_v52 }
 0x6cf   :  { %v1853_v57 = vpop.xlane.xlu0 %1852 }
 0x6d0   :  { %v1858_v35 = vadd.f32 %v1857_v28, %v1853_v57 }
 0x6d2   :  { %v1860_v48 = vsub.f32 0.0, %v1858_v35 }
 0x6d4   :  { %v1862_v60 = vmul.f32 1.442695, %v1860_v48 }
 0x6d6   :  { %2419 = vpow2.f32 %v1862_v60 }
 0x6d9   :  { %v1855_v12 = vpop.xlane.xlu1 %1854 }
 0x6da   :  { %v1859_v11 = vadd.f32 %v1857_v28, %v1855_v12 }
 0x6dc   :  { %v2420_v8 = vpop.eup %2419  ;;  %v1861_v32 = vsub.f32 0.0, %v1859_v11 }
 0x6dd   :  { %v1866_v20 = vadd.f32 1.0, %v2420_v8 }
 0x6de   :  { %v1864_v55 = vmul.f32 1.442695, %v1861_v32 }
 0x6df   :  { %2421 = vrcp.f32 %v1866_v20 }
 0x6e0   :  { %2423 = vpow2.f32 %v1864_v55 }
 0x6e5   :  { %v2422_v5 = vpop.eup %2421 }
 0x6e6   :  { %v2424_v27 = vpop.eup %2423  ;;  %1871 = vst.msk [vmem:[%s3335_s6] sm:$0xff] %vm1870_vm1, %v2422_v5 }
 0x6e7   :  { %v1867_v43 = vadd.f32 1.0, %v2424_v27 }
 0x6e9   :  { %2425 = vrcp.f32 %v1867_v43 }
 0x6ef   :  { %v2426_v61 = vpop.eup %2425 }
 0x6f0   :  { %1872 = vst.msk [vmem:[%s3335_s6 + $0x8] sm:$0xff] %vm1870_vm1, %v2426_v61 }
 0x6f1   :  { %1877 = vsyncpa [#allocation5], 1 }
 0x6f2   :  { %1878 = vsyncpa [#allocation7], 1 }

</bundles_post_ra>
